<compile_context>
chip_gen: v5e
topology: v5e:2x2
jax: 0.10.0
libtpu: 0.0.40
codegen_flags: <defaults>
</compile_context>

<pallas_src>
import functools

import jax
import jax.numpy as jnp
from jax.experimental import pallas as pl
from jax.experimental.pallas import tpu as pltpu

LANE = 128


def _round_up(n, m):
    return ((n + m - 1) // m) * m


def _autoencoder_kernel(
    x_ref,
    w1, b1, w2, b2, w3, b3,      # encoder layers 1-3 (bf16 weights, f32 biases)
    wc, bc,                       # fused layer 4 || (4@5): (din_pad, 2*latent_pad)
    w6, b6, w7, b7, w8, b8,       # decoder layers 6-8
    enc_ref, dec_ref,
    *, latent_pad, bf16_tanh,
):
    f32 = jnp.float32
    bf16 = jnp.bfloat16

    def dense(h, w_r, b_r):
        # bf16 x bf16 matmul on the MXU, f32 accumulation, f32 bias add.
        return jnp.dot(h.astype(bf16), w_r[...], preferred_element_type=f32) + b_r[...]

    def act(z):
        # tanh on the EUP; bf16 path on v6e/v7x (next matmul consumes bf16 anyway).
        if bf16_tanh:
            return jnp.tanh(z.astype(bf16))
        return jnp.tanh(z)

    x = x_ref[...]

    # ---- encoder (layers 1-3) ----
    h = act(dense(x, w1, b1))
    h = act(dense(h, w2, b2))
    h = act(dense(h, w3, b3))

    # ---- fused layer 4 + layer 5 pre-activation (one N=2*latent_pad matmul) ----
    comb = dense(h, wc, bc)                      # (tb, 2*latent_pad), f32
    enc = comb[:, :latent_pad]                   # padded latent: lanes 64..127 are 0
    enc_ref[...] = enc.astype(enc_ref.dtype)

    # ---- decoder (layers 5-8) ----
    h = act(comb[:, latent_pad:])                # tanh(enc @ w5 + b5), via fused weights
    h = act(dense(h, w6, b6))
    h = act(dense(h, w7, b7))
    z = dense(h, w8, b8)
    # sigmoid(z) = 0.5 * tanh(0.5*z) + 0.5  -> single EUP op per lane, exact identity.
    dec = 0.5 * jnp.tanh(0.5 * z) + 0.5
    dec_ref[...] = dec.astype(dec_ref.dtype)


def prepare_params(params, ddd):
    """One-time prep (outside jit): zero-pad to 128 multiples, cast weights to bf16,
    and fuse layers 4 & 5 into a single concatenated weight/bias.

    params: flat tuple (w1, b1, ..., w8, b8) in f32; weights stored (in, out),
    biases (1, out).  Returns the tuple of arrays the kernel consumes.
    """
    dims = [ddd, 300, 200, 100, 64, 100, 200, 300, ddd]
    dims_pad = [_round_up(d, LANE) for d in dims]
    latent_pad = dims_pad[4]

    def pad_wb(w, b, din_p, dout_p):
        wp = jnp.zeros((din_p, dout_p), jnp.bfloat16)
        wp = wp.at[: w.shape[0], : w.shape[1]].set(w.astype(jnp.bfloat16))
        bp = jnp.zeros((1, dout_p), jnp.float32)
        bp = bp.at[:, : b.shape[1]].set(b.astype(jnp.float32))
        return wp, bp

    prepped = []
    # encoder layers 1-3
    for li in range(3):
        w, b = params[2 * li], params[2 * li + 1]
        wp, bp = pad_wb(w, b, dims_pad[li], dims_pad[li + 1])
        prepped.extend([wp, bp])

    # fused layer 4 || (4 @ 5): left half -> encoded, right half -> layer-5 pre-act.
    w4, b4 = params[6], params[7]
    w5, b5 = params[8], params[9]
    w45 = w4 @ w5                          # (100, 100) in f32, then bf16
    b45 = b4 @ w5 + b5                     # (1, 100) in f32
    din_p = dims_pad[3]
    wc = jnp.zeros((din_p, 2 * latent_pad), jnp.bfloat16)
    wc = wc.at[: w4.shape[0], : w4.shape[1]].set(w4.astype(jnp.bfloat16))
    wc = wc.at[: w45.shape[0], latent_pad: latent_pad + w45.shape[1]].set(
        w45.astype(jnp.bfloat16))
    bc = jnp.zeros((1, 2 * latent_pad), jnp.float32)
    bc = bc.at[:, : b4.shape[1]].set(b4.astype(jnp.float32))
    bc = bc.at[:, latent_pad: latent_pad + b45.shape[1]].set(b45.astype(jnp.float32))
    prepped.extend([wc, bc])

    # decoder layers 6-8
    for li in range(5, 8):
        w, b = params[2 * li], params[2 * li + 1]
        wp, bp = pad_wb(w, b, dims_pad[li], dims_pad[li + 1])
        prepped.extend([wp, bp])

    return tuple(jax.device_put(p) for p in prepped)


def _default_bf16_tanh():
    # bf16 EUP path exists on v6e / v7x; v5e and older compute tanh in f32 anyway.
    try:
        kind = jax.devices()[0].device_kind.lower()
    except Exception:
        return False
    return ("v6" in kind) or ("v7" in kind) or ("7x" in kind)


def _pick_tb(B, block_b):
    if B >= 16:
        # At least 2 grid steps so the "parallel" axis can shard across v7x's 2 TCs.
        return min(block_b, _round_up((B + 1) // 2, 8))
    return min(block_b, _round_up(B, 8))


@functools.partial(jax.jit, static_argnames=("block_b", "bf16_tanh"))
def autoencoder_forward(x, prepped, block_b=512, bf16_tanh=False):
    """Forward pass.  Returns (encoded [B, 64], decoded [B, ddd]) in f32."""
    B, ddd = x.shape
    d_pad = _round_up(ddd, LANE)
    latent_pad = _round_up(64, LANE)

    # --- pad batch + feature axes of x, cast to bf16 (kernel casts before dot anyway) ---
    tb = _pick_tb(B, block_b)
    b_pad = _round_up(B, tb)
    xp = jnp.zeros((b_pad, d_pad), jnp.bfloat16)
    xp = xp.at[:B, :ddd].set(x.astype(jnp.bfloat16))

    grid = (b_pad // tb,)

    x_spec = pl.BlockSpec((tb, d_pad), lambda i: (i, 0))
    # Weights / biases: full-array blocks with constant index_map -> resident in VMEM.
    param_specs = [pl.BlockSpec(p.shape, lambda i: (0, 0)) for p in prepped]
    enc_spec = pl.BlockSpec((tb, latent_pad), lambda i: (i, 0))
    dec_spec = pl.BlockSpec((tb, d_pad), lambda i: (i, 0))

    # Cost estimate for the fused layer structure (advisory).
    mxu_dims = [
        (d_pad, 384), (384, 256), (256, 128),          # encoder 1-3
        (128, 2 * latent_pad),                          # fused 4||5
        (latent_pad, 256), (256, 384), (384, d_pad),    # decoder 6-8
    ]
    flops = 2 * b_pad * sum(a * b for a, b in mxu_dims)
    transcendentals = b_pad * (384 + 256 + 128 + latent_pad + 256 + 384 + d_pad)
    param_bytes = sum(int(p.size) * p.dtype.itemsize for p in prepped)
    io_bytes = xp.size * 2 + b_pad * latent_pad * 4 + b_pad * d_pad * 4
    bytes_accessed = param_bytes + io_bytes

    # VMEM budget from actual resident sizes (params + double-buffered IO tiles) + slack.
    io_tile_bytes = tb * d_pad * 2 + tb * latent_pad * 4 + tb * d_pad * 4
    vmem_limit = int(2 * param_bytes + 2 * io_tile_bytes + (8 << 20))
    vmem_limit = min(max(vmem_limit, 32 << 20), 64 << 20)

    kernel = functools.partial(
        _autoencoder_kernel, latent_pad=latent_pad, bf16_tanh=bf16_tanh)

    enc_p, dec_p = pl.pallas_call(
        kernel,
        out_shape=(
            jax.ShapeDtypeStruct((b_pad, latent_pad), jnp.float32),
            jax.ShapeDtypeStruct((b_pad, d_pad), jnp.float32),
        ),
        grid=grid,
        in_specs=[x_spec] + param_specs,
        out_specs=(enc_spec, dec_spec),
        compiler_params=pltpu.CompilerParams(
            dimension_semantics=("parallel",),
            vmem_limit_bytes=vmem_limit,
        ),
        cost_estimate=pl.CostEstimate(
            flops=flops,
            transcendentals=transcendentals,
            bytes_accessed=bytes_accessed,
        ),
    )(xp, *prepped)

    # Slice padded outputs back to module shapes.
    return enc_p[:B, :64], dec_p[:B, :ddd]


def init_params(key, ddd):
    """Deterministic synthetic init matching nn.Linear shapes (weights stored transposed)."""
    dims = [(ddd, 300), (300, 200), (200, 100), (100, 64),   # encoder
            (64, 100), (100, 200), (200, 300), (300, ddd)]   # decoder
    params = []
    for din, dout in dims:
        kw, kb, key = jax.random.split(key, 3)
        bound = 1.0 / jnp.sqrt(jnp.float32(din))   # same scale as PyTorch default init
        w = jax.random.uniform(kw, (din, dout), jnp.float32, -bound, bound)
        b = jax.random.uniform(kb, (1, dout), jnp.float32, -bound, bound)
        params.extend([w, b])
    return tuple(params)


def reference_forward(x, params):
    """Plain-JAX f32 reference for sanity checking the kernel."""
    (w1, b1, w2, b2, w3, b3, w4, b4,
     w5, b5, w6, b6, w7, b7, w8, b8) = params
    h = jnp.tanh(x @ w1 + b1)
    h = jnp.tanh(h @ w2 + b2)
    h = jnp.tanh(h @ w3 + b3)
    enc = h @ w4 + b4
    h = jnp.tanh(enc @ w5 + b5)
    h = jnp.tanh(h @ w6 + b6)
    h = jnp.tanh(h @ w7 + b7)
    dec = jax.nn.sigmoid(h @ w8 + b8)
    return enc, dec


if __name__ == "__main__":
    key = jax.random.PRNGKey(0)
    B, DDD = 8, 128                     # small batch, ddd=128 input features
    kx, kp = jax.random.split(key)
    x = jax.random.normal(kx, (B, DDD), jnp.float32)
    params = init_params(kp, DDD)

    prepped = prepare_params(params, DDD)        # one-time pad / cast / fuse
    bf16_tanh = _default_bf16_tanh()

    enc, dec = autoencoder_forward(x, prepped, bf16_tanh=bf16_tanh)
    jax.block_until_ready((enc, dec))

    enc_ref, dec_ref = reference_forward(x, params)
    assert enc.shape == (B, 64) and dec.shape == (B, DDD)
    # bf16-weight matmuls with f32 accumulation: relaxed tolerance vs the f32 reference.
    assert jnp.allclose(enc, enc_ref, atol=5e-2, rtol=5e-2), \
        float(jnp.max(jnp.abs(enc - enc_ref)))
    assert jnp.allclose(dec, dec_ref, atol=5e-2, rtol=5e-2), \
        float(jnp.max(jnp.abs(dec - dec_ref)))

    print("KERNEL_OK")
</pallas_src>

<mosaic_0001>
module attributes {stable_mosaic.version = 11 : i64} {
  func.func @_autoencoder_kernel(%arg0: i32, %arg1: memref<8x128xbf16, #tpu.memory_space<vmem>>, %arg2: memref<128x384xbf16, #tpu.memory_space<vmem>>, %arg3: memref<1x384xf32, #tpu.memory_space<vmem>>, %arg4: memref<384x256xbf16, #tpu.memory_space<vmem>>, %arg5: memref<1x256xf32, #tpu.memory_space<vmem>>, %arg6: memref<256x128xbf16, #tpu.memory_space<vmem>>, %arg7: memref<1x128xf32, #tpu.memory_space<vmem>>, %arg8: memref<128x256xbf16, #tpu.memory_space<vmem>>, %arg9: memref<1x256xf32, #tpu.memory_space<vmem>>, %arg10: memref<128x256xbf16, #tpu.memory_space<vmem>>, %arg11: memref<1x256xf32, #tpu.memory_space<vmem>>, %arg12: memref<256x384xbf16, #tpu.memory_space<vmem>>, %arg13: memref<1x384xf32, #tpu.memory_space<vmem>>, %arg14: memref<384x128xbf16, #tpu.memory_space<vmem>>, %arg15: memref<1x128xf32, #tpu.memory_space<vmem>>, %arg16: memref<8x128xf32, #tpu.memory_space<vmem>>, %arg17: memref<8x128xf32, #tpu.memory_space<vmem>>) attributes {dimension_semantics = [#tpu.dimension_semantics<parallel>], iteration_bounds = array<i64: 1>, scalar_prefetch = 0 : i64, scratch_operands = 0 : i64, tpu.core_type = #tpu.core_type<tc>, window_params = [{transform_indices = @transform_0, window_bounds = array<i64: 8, 128>}, {pipeline_mode = #tpu.pipeline_mode<synchronous>, transform_indices = @transform_1, window_bounds = array<i64: 128, 384>}, {pipeline_mode = #tpu.pipeline_mode<synchronous>, transform_indices = @transform_2, window_bounds = array<i64: 1, 384>}, {pipeline_mode = #tpu.pipeline_mode<synchronous>, transform_indices = @transform_3, window_bounds = array<i64: 384, 256>}, {pipeline_mode = #tpu.pipeline_mode<synchronous>, transform_indices = @transform_4, window_bounds = array<i64: 1, 256>}, {pipeline_mode = #tpu.pipeline_mode<synchronous>, transform_indices = @transform_5, window_bounds = array<i64: 256, 128>}, {pipeline_mode = #tpu.pipeline_mode<synchronous>, transform_indices = @transform_6, window_bounds = array<i64: 1, 128>}, {pipeline_mode = #tpu.pipeline_mode<synchronous>, transform_indices = @transform_7, window_bounds = array<i64: 128, 256>}, {pipeline_mode = #tpu.pipeline_mode<synchronous>, transform_indices = @transform_8, window_bounds = array<i64: 1, 256>}, {pipeline_mode = #tpu.pipeline_mode<synchronous>, transform_indices = @transform_9, window_bounds = array<i64: 128, 256>}, {pipeline_mode = #tpu.pipeline_mode<synchronous>, transform_indices = @transform_10, window_bounds = array<i64: 1, 256>}, {pipeline_mode = #tpu.pipeline_mode<synchronous>, transform_indices = @transform_11, window_bounds = array<i64: 256, 384>}, {pipeline_mode = #tpu.pipeline_mode<synchronous>, transform_indices = @transform_12, window_bounds = array<i64: 1, 384>}, {pipeline_mode = #tpu.pipeline_mode<synchronous>, transform_indices = @transform_13, window_bounds = array<i64: 384, 128>}, {pipeline_mode = #tpu.pipeline_mode<synchronous>, transform_indices = @transform_14, window_bounds = array<i64: 1, 128>}, {transform_indices = @transform_15, window_bounds = array<i64: 8, 128>}, {transform_indices = @transform_16, window_bounds = array<i64: 8, 128>}]} {
    %c0 = arith.constant 0 : index
    %c0_0 = arith.constant 0 : index
    %0 = vector.load %arg1[%c0, %c0_0] : memref<8x128xbf16, #tpu.memory_space<vmem>>, vector<8x128xbf16>
    %c0_1 = arith.constant 0 : index
    %c0_2 = arith.constant 0 : index
    %1 = vector.load %arg2[%c0_1, %c0_2] : memref<128x384xbf16, #tpu.memory_space<vmem>>, vector<128x384xbf16>
    %cst = arith.constant dense<0.000000e+00> : vector<8x384xf32>
    %2 = tpu.matmul %0, %1, %cst {dimension_numbers = #tpu.dot_dimension_numbers<[1], [0], [0], [1], [0, 0, 1, 1], [], []>} : vector<8x128xbf16>, vector<128x384xbf16>, vector<8x384xf32> -> vector<8x384xf32>
    %c0_3 = arith.constant 0 : index
    %c0_4 = arith.constant 0 : index
    %3 = vector.load %arg3[%c0_3, %c0_4] : memref<1x384xf32, #tpu.memory_space<vmem>>, vector<1x384xf32>
    %4 = vector.broadcast %3 : vector<1x384xf32> to vector<8x384xf32>
    %5 = arith.addf %2, %4 : vector<8x384xf32>
    %6 = math.tanh %5 : vector<8x384xf32>
    %7 = arith.truncf %6 : vector<8x384xf32> to vector<8x384xbf16>
    %c0_5 = arith.constant 0 : index
    %c0_6 = arith.constant 0 : index
    %8 = vector.load %arg4[%c0_5, %c0_6] : memref<384x256xbf16, #tpu.memory_space<vmem>>, vector<384x256xbf16>
    %cst_7 = arith.constant dense<0.000000e+00> : vector<8x256xf32>
    %9 = tpu.matmul %7, %8, %cst_7 {dimension_numbers = #tpu.dot_dimension_numbers<[1], [0], [0], [1], [0, 0, 1, 1], [], []>} : vector<8x384xbf16>, vector<384x256xbf16>, vector<8x256xf32> -> vector<8x256xf32>
    %c0_8 = arith.constant 0 : index
    %c0_9 = arith.constant 0 : index
    %10 = vector.load %arg5[%c0_8, %c0_9] : memref<1x256xf32, #tpu.memory_space<vmem>>, vector<1x256xf32>
    %11 = vector.broadcast %10 : vector<1x256xf32> to vector<8x256xf32>
    %12 = arith.addf %9, %11 : vector<8x256xf32>
    %13 = math.tanh %12 : vector<8x256xf32>
    %14 = arith.truncf %13 : vector<8x256xf32> to vector<8x256xbf16>
    %c0_10 = arith.constant 0 : index
    %c0_11 = arith.constant 0 : index
    %15 = vector.load %arg6[%c0_10, %c0_11] : memref<256x128xbf16, #tpu.memory_space<vmem>>, vector<256x128xbf16>
    %cst_12 = arith.constant dense<0.000000e+00> : vector<8x128xf32>
    %16 = tpu.matmul %14, %15, %cst_12 {dimension_numbers = #tpu.dot_dimension_numbers<[1], [0], [0], [1], [0, 0, 1, 1], [], []>} : vector<8x256xbf16>, vector<256x128xbf16>, vector<8x128xf32> -> vector<8x128xf32>
    %c0_13 = arith.constant 0 : index
    %c0_14 = arith.constant 0 : index
    %17 = vector.load %arg7[%c0_13, %c0_14] : memref<1x128xf32, #tpu.memory_space<vmem>>, vector<1x128xf32>
    %18 = vector.broadcast %17 : vector<1x128xf32> to vector<8x128xf32>
    %19 = arith.addf %16, %18 : vector<8x128xf32>
    %20 = math.tanh %19 : vector<8x128xf32>
    %21 = arith.truncf %20 : vector<8x128xf32> to vector<8x128xbf16>
    %c0_15 = arith.constant 0 : index
    %c0_16 = arith.constant 0 : index
    %22 = vector.load %arg8[%c0_15, %c0_16] : memref<128x256xbf16, #tpu.memory_space<vmem>>, vector<128x256xbf16>
    %cst_17 = arith.constant dense<0.000000e+00> : vector<8x256xf32>
    %23 = tpu.matmul %21, %22, %cst_17 {dimension_numbers = #tpu.dot_dimension_numbers<[1], [0], [0], [1], [0, 0, 1, 1], [], []>} : vector<8x128xbf16>, vector<128x256xbf16>, vector<8x256xf32> -> vector<8x256xf32>
    %c0_18 = arith.constant 0 : index
    %c0_19 = arith.constant 0 : index
    %24 = vector.load %arg9[%c0_18, %c0_19] : memref<1x256xf32, #tpu.memory_space<vmem>>, vector<1x256xf32>
    %25 = vector.broadcast %24 : vector<1x256xf32> to vector<8x256xf32>
    %26 = arith.addf %23, %25 : vector<8x256xf32>
    %27 = vector.extract_strided_slice %26 {offsets = [0, 0], sizes = [8, 128], strides = [1, 1]} : vector<8x256xf32> to vector<8x128xf32>
    %c0_20 = arith.constant 0 : index
    %c0_21 = arith.constant 0 : index
    %28 = vector.load %arg16[%c0_20, %c0_21] : memref<8x128xf32, #tpu.memory_space<vmem>>, vector<8x128xf32>
    tpu.vector_store %arg16[%c0_20, %c0_21], %27 {strides = array<i32>} : memref<8x128xf32, #tpu.memory_space<vmem>>, vector<8x128xf32>,
    %29 = vector.extract_strided_slice %26 {offsets = [0, 128], sizes = [8, 128], strides = [1, 1]} : vector<8x256xf32> to vector<8x128xf32>
    %30 = math.tanh %29 : vector<8x128xf32>
    %31 = arith.truncf %30 : vector<8x128xf32> to vector<8x128xbf16>
    %c0_22 = arith.constant 0 : index
    %c0_23 = arith.constant 0 : index
    %32 = vector.load %arg10[%c0_22, %c0_23] : memref<128x256xbf16, #tpu.memory_space<vmem>>, vector<128x256xbf16>
    %cst_24 = arith.constant dense<0.000000e+00> : vector<8x256xf32>
    %33 = tpu.matmul %31, %32, %cst_24 {dimension_numbers = #tpu.dot_dimension_numbers<[1], [0], [0], [1], [0, 0, 1, 1], [], []>} : vector<8x128xbf16>, vector<128x256xbf16>, vector<8x256xf32> -> vector<8x256xf32>
    %c0_25 = arith.constant 0 : index
    %c0_26 = arith.constant 0 : index
    %34 = vector.load %arg11[%c0_25, %c0_26] : memref<1x256xf32, #tpu.memory_space<vmem>>, vector<1x256xf32>
    %35 = vector.broadcast %34 : vector<1x256xf32> to vector<8x256xf32>
    %36 = arith.addf %33, %35 : vector<8x256xf32>
    %37 = math.tanh %36 : vector<8x256xf32>
    %38 = arith.truncf %37 : vector<8x256xf32> to vector<8x256xbf16>
    %c0_27 = arith.constant 0 : index
    %c0_28 = arith.constant 0 : index
    %39 = vector.load %arg12[%c0_27, %c0_28] : memref<256x384xbf16, #tpu.memory_space<vmem>>, vector<256x384xbf16>
    %cst_29 = arith.constant dense<0.000000e+00> : vector<8x384xf32>
    %40 = tpu.matmul %38, %39, %cst_29 {dimension_numbers = #tpu.dot_dimension_numbers<[1], [0], [0], [1], [0, 0, 1, 1], [], []>} : vector<8x256xbf16>, vector<256x384xbf16>, vector<8x384xf32> -> vector<8x384xf32>
    %c0_30 = arith.constant 0 : index
    %c0_31 = arith.constant 0 : index
    %41 = vector.load %arg13[%c0_30, %c0_31] : memref<1x384xf32, #tpu.memory_space<vmem>>, vector<1x384xf32>
    %42 = vector.broadcast %41 : vector<1x384xf32> to vector<8x384xf32>
    %43 = arith.addf %40, %42 : vector<8x384xf32>
    %44 = math.tanh %43 : vector<8x384xf32>
    %45 = arith.truncf %44 : vector<8x384xf32> to vector<8x384xbf16>
    %c0_32 = arith.constant 0 : index
    %c0_33 = arith.constant 0 : index
    %46 = vector.load %arg14[%c0_32, %c0_33] : memref<384x128xbf16, #tpu.memory_space<vmem>>, vector<384x128xbf16>
    %cst_34 = arith.constant dense<0.000000e+00> : vector<8x128xf32>
    %47 = tpu.matmul %45, %46, %cst_34 {dimension_numbers = #tpu.dot_dimension_numbers<[1], [0], [0], [1], [0, 0, 1, 1], [], []>} : vector<8x384xbf16>, vector<384x128xbf16>, vector<8x128xf32> -> vector<8x128xf32>
    %c0_35 = arith.constant 0 : index
    %c0_36 = arith.constant 0 : index
    %48 = vector.load %arg15[%c0_35, %c0_36] : memref<1x128xf32, #tpu.memory_space<vmem>>, vector<1x128xf32>
    %49 = vector.broadcast %48 : vector<1x128xf32> to vector<8x128xf32>
    %50 = arith.addf %47, %49 : vector<8x128xf32>
    %cst_37 = arith.constant 5.000000e-01 : f32
    %51 = vector.broadcast %cst_37 : f32 to vector<8x128xf32>
    %52 = arith.mulf %51, %50 : vector<8x128xf32>
    %53 = math.tanh %52 : vector<8x128xf32>
    %cst_38 = arith.constant 5.000000e-01 : f32
    %54 = vector.broadcast %cst_38 : f32 to vector<8x128xf32>
    %55 = arith.mulf %54, %53 : vector<8x128xf32>
    %cst_39 = arith.constant 5.000000e-01 : f32
    %56 = vector.broadcast %cst_39 : f32 to vector<8x128xf32>
    %57 = arith.addf %55, %56 : vector<8x128xf32>
    %c0_40 = arith.constant 0 : index
    %c0_41 = arith.constant 0 : index
    %58 = vector.load %arg17[%c0_40, %c0_41] : memref<8x128xf32, #tpu.memory_space<vmem>>, vector<8x128xf32>
    tpu.vector_store %arg17[%c0_40, %c0_41], %57 {strides = array<i32>} : memref<8x128xf32, #tpu.memory_space<vmem>>, vector<8x128xf32>,
    return
  }
  func.func @transform_0(%arg0: i32) -> (i32, i32) {
    %c0_i32 = arith.constant 0 : i32
    %c0_i32_0 = arith.constant 0 : i32
    return %arg0, %c0_i32 : i32, i32
  }
  func.func @transform_1(%arg0: i32) -> (i32, i32) {
    %c0_i32 = arith.constant 0 : i32
    %c0_i32_0 = arith.constant 0 : i32
    %c0_i32_1 = arith.constant 0 : i32
    return %c0_i32, %c0_i32_0 : i32, i32
  }
  func.func @transform_2(%arg0: i32) -> (i32, i32) {
    %c0_i32 = arith.constant 0 : i32
    %c0_i32_0 = arith.constant 0 : i32
    %c0_i32_1 = arith.constant 0 : i32
    return %c0_i32, %c0_i32_0 : i32, i32
  }
  func.func @transform_3(%arg0: i32) -> (i32, i32) {
    %c0_i32 = arith.constant 0 : i32
    %c0_i32_0 = arith.constant 0 : i32
    %c0_i32_1 = arith.constant 0 : i32
    return %c0_i32, %c0_i32_0 : i32, i32
  }
  func.func @transform_4(%arg0: i32) -> (i32, i32) {
    %c0_i32 = arith.constant 0 : i32
    %c0_i32_0 = arith.constant 0 : i32
    %c0_i32_1 = arith.constant 0 : i32
    return %c0_i32, %c0_i32_0 : i32, i32
  }
  func.func @transform_5(%arg0: i32) -> (i32, i32) {
    %c0_i32 = arith.constant 0 : i32
    %c0_i32_0 = arith.constant 0 : i32
    %c0_i32_1 = arith.constant 0 : i32
    return %c0_i32, %c0_i32_0 : i32, i32
  }
  func.func @transform_6(%arg0: i32) -> (i32, i32) {
    %c0_i32 = arith.constant 0 : i32
    %c0_i32_0 = arith.constant 0 : i32
    %c0_i32_1 = arith.constant 0 : i32
    return %c0_i32, %c0_i32_0 : i32, i32
  }
  func.func @transform_7(%arg0: i32) -> (i32, i32) {
    %c0_i32 = arith.constant 0 : i32
    %c0_i32_0 = arith.constant 0 : i32
    %c0_i32_1 = arith.constant 0 : i32
    return %c0_i32, %c0_i32_0 : i32, i32
  }
  func.func @transform_8(%arg0: i32) -> (i32, i32) {
    %c0_i32 = arith.constant 0 : i32
    %c0_i32_0 = arith.constant 0 : i32
    %c0_i32_1 = arith.constant 0 : i32
    return %c0_i32, %c0_i32_0 : i32, i32
  }
  func.func @transform_9(%arg0: i32) -> (i32, i32) {
    %c0_i32 = arith.constant 0 : i32
    %c0_i32_0 = arith.constant 0 : i32
    %c0_i32_1 = arith.constant 0 : i32
    return %c0_i32, %c0_i32_0 : i32, i32
  }
  func.func @transform_10(%arg0: i32) -> (i32, i32) {
    %c0_i32 = arith.constant 0 : i32
    %c0_i32_0 = arith.constant 0 : i32
    %c0_i32_1 = arith.constant 0 : i32
    return %c0_i32, %c0_i32_0 : i32, i32
  }
  func.func @transform_11(%arg0: i32) -> (i32, i32) {
    %c0_i32 = arith.constant 0 : i32
    %c0_i32_0 = arith.constant 0 : i32
    %c0_i32_1 = arith.constant 0 : i32
    return %c0_i32, %c0_i32_0 : i32, i32
  }
  func.func @transform_12(%arg0: i32) -> (i32, i32) {
    %c0_i32 = arith.constant 0 : i32
    %c0_i32_0 = arith.constant 0 : i32
    %c0_i32_1 = arith.constant 0 : i32
    return %c0_i32, %c0_i32_0 : i32, i32
  }
  func.func @transform_13(%arg0: i32) -> (i32, i32) {
    %c0_i32 = arith.constant 0 : i32
    %c0_i32_0 = arith.constant 0 : i32
    %c0_i32_1 = arith.constant 0 : i32
    return %c0_i32, %c0_i32_0 : i32, i32
  }
  func.func @transform_14(%arg0: i32) -> (i32, i32) {
    %c0_i32 = arith.constant 0 : i32
    %c0_i32_0 = arith.constant 0 : i32
    %c0_i32_1 = arith.constant 0 : i32
    return %c0_i32, %c0_i32_0 : i32, i32
  }
  func.func @transform_15(%arg0: i32) -> (i32, i32) {
    %c0_i32 = arith.constant 0 : i32
    %c0_i32_0 = arith.constant 0 : i32
    return %arg0, %c0_i32 : i32, i32
  }
  func.func @transform_16(%arg0: i32) -> (i32, i32) {
    %c0_i32 = arith.constant 0 : i32
    %c0_i32_0 = arith.constant 0 : i32
    return %arg0, %c0_i32 : i32, i32
  }
}

</mosaic_0001>

<bundles_post_ra>
// kernel: autoencoder_forward.1
= control target key start
LH: loop header
LB: loop body
LE: loop exit
PB: predicated region body
PF: predicated region fallthrough
CT: control target
= control target key end

     0   :  { %s3255_s0 = inlined_call_operand.vmem [shape: bf16[8,128], index: 0, kind: input, shape index: {}]   ;;  %s3256_s1 = inlined_call_operand.hbm [shape: bf16[128,384], index: 1, kind: input, shape index: {}]   ;;  %s3257_s2 = inlined_call_operand.vmem [shape: f32[1,384], index: 2, kind: input, shape index: {}]   ;;  %s3258_s3 = inlined_call_operand.hbm [shape: bf16[384,256], index: 3, kind: input, shape index: {}]   ;;  %s3259_s4 = inlined_call_operand.vmem [shape: f32[1,256], index: 4, kind: input, shape index: {}]   ;;  %s3260_s5 = inlined_call_operand.hbm [shape: bf16[256,128], index: 5, kind: input, shape index: {}]   ;;  %s3261_s6 = inlined_call_operand.vmem [shape: f32[1,128], index: 6, kind: input, shape index: {}]   ;;  %s3262_s7 = inlined_call_operand.hbm [shape: bf16[128,256], index: 7, kind: input, shape index: {}]   ;;  %s3263_s8 = inlined_call_operand.vmem [shape: f32[1,256], index: 8, kind: input, shape index: {}]   ;;  %s3264_s9 = inlined_call_operand.hbm [shape: bf16[128,256], index: 9, kind: input, shape index: {}]   ;;  %s3265_s10 = inlined_call_operand.vmem [shape: f32[1,256], index: 10, kind: input, shape index: {}]   ;;  %s3266_s11 = inlined_call_operand.hbm [shape: bf16[256,384], index: 11, kind: input, shape index: {}]   ;;  %s3267_s12 = inlined_call_operand.vmem [shape: f32[1,384], index: 12, kind: input, shape index: {}]   ;;  %s3268_s13 = inlined_call_operand.hbm [shape: bf16[384,128], index: 13, kind: input, shape index: {}]   ;;  %s3269_s14 = inlined_call_operand.vmem [shape: f32[1,128], index: 14, kind: input, shape index: {}]   ;;  %s3270_s15 = inlined_call_operand.hbm [shape: f32[8,128], index: 15, kind: output, shape index: {0}]   ;;  %s3271_s16 = inlined_call_operand.hbm [shape: f32[8,128], index: 16, kind: output, shape index: {1}]  }
   0x1   :  { %3273 = sst [smem:[#allocation23_spill]] %s3255_s0 }
   0x2   :  { %22 = vsyncpa [#allocation3], 0 }
   0x3   :  { %23 = vsyncpa [#allocation6], 0 }
   0x4   :  { %24 = vsyncpa [#allocation9], 0 }
   0x5   :  { %25 = vsyncpa [#allocation12], 0 }
   0x6   :  { %26 = vsyncpa [#allocation4], 0  ;;  %s49_s23 = sshll.u32 %s3258_s3, 4  ;;  %s50_s23 = int_to_ptr.hbm [resolvable:$true] %s49_s23 }
   0x7   :  { %27 = vsyncpa [#allocation16], 0  ;;  %s3095_s24 = smov [#allocation5]   ;;  %s79_s28 = sshll.u32 %s3262_s7, 4  ;;  %s80_s28 = int_to_ptr.hbm [resolvable:$true] %s79_s28 }
   0x8   :  { %s51_s25 = sshll.u32 %s3095_s24, 4  ;;  %s3272_s29 = smov 128   ;;  %s52_s25 = int_to_ptr.vmem [resolvable:$true] %s51_s25 }
   0x9   :  { %s3097_s30 = smov 8   ;;  %s3098_s0 = smov [#allocation8]  }
   0xa   :  { %57 = dma.hbm_to_vmem [thread:$0]  %s50_s23, 6144, %s52_s25, [#allocation6], %s3272_s29, %s3272_s29, %s3097_s30  }
   0xb   :  { %s81_s17 = sshll.u32 %s3098_s0, 4  ;;  %s109_s19 = sshll.u32 %s3266_s11, 4  ;;  %s82_s17 = int_to_ptr.vmem [resolvable:$true] %s81_s17  ;;  %s110_s19 = int_to_ptr.hbm [resolvable:$true] %s109_s19 }
   0xc   :  { %87 = dma.hbm_to_vmem [thread:$0]  %s80_s28, 2048, %s82_s17, [#allocation9], %s3272_s29, %s3272_s29, %s3097_s30  }
   0xd   :  { %s3099_s7 = smov [#allocation11]   ;;  %s34_s23 = sshll.u32 %s3256_s1, 4  ;;  %s35_s23 = int_to_ptr.hbm [resolvable:$true] %s34_s23 }
   0xe   :  { %s111_s20 = sshll.u32 %s3099_s7, 4  ;;  %s3100_s24 = smov 192   ;;  %s112_s20 = int_to_ptr.vmem [resolvable:$true] %s111_s20 }
   0xf   :  { %s3101_s25 = smov 12   ;;  %s3102_s26 = smov [#allocation2]  }
  0x10   :  { %117 = dma.hbm_to_vmem [thread:$0]  %s110_s19, 6144, %s112_s20, [#allocation12], %s3100_s24, %s3100_s24, %s3101_s25  }
  0x11   :  { %s36_s27 = sshll.u32 %s3102_s26, 4  ;;  %s64_s17 = sshll.u32 %s3260_s5, 4  ;;  %s37_s27 = int_to_ptr.vmem [resolvable:$true] %s36_s27  ;;  %s65_s17 = int_to_ptr.hbm [resolvable:$true] %s64_s17 }
  0x12   :  { %42 = dma.hbm_to_vmem [thread:$0]  %s35_s23, 3072, %s37_s27, [#allocation3], %s3100_s24, %s3100_s24, %s3101_s25  }
  0x13   :  { %s3103_s11 = smov [#allocation7]   ;;  %s94_s1 = sshll.u32 %s3264_s9, 4  ;;  %s95_s1 = int_to_ptr.hbm [resolvable:$true] %s94_s1 }
  0x14   :  { %s66_s3 = sshll.u32 %s3103_s11, 4  ;;  %s3104_s21 = smov 64   ;;  %s67_s3 = int_to_ptr.vmem [resolvable:$true] %s66_s3 }
  0x15   :  { %s3105_s22 = smov 4   ;;  %s3106_s19 = smov [#allocation10]  }
  0x16   :  { %72 = dma.hbm_to_vmem [thread:$0]  %s65_s17, 2048, %s67_s3, [#allocation6], %s3104_s21, %s3104_s21, %s3105_s22  }
  0x17   :  { %s96_s20 = sshll.u32 %s3106_s19, 4  ;;  %s124_s5 = sshll.u32 %s3268_s13, 4  ;;  %s97_s20 = int_to_ptr.vmem [resolvable:$true] %s96_s20  ;;  %s125_s5 = int_to_ptr.hbm [resolvable:$true] %s124_s5 }
  0x18   :  { %s3274_s23 = smov 128   ;;  %s3107_s24 = smov [#allocation13]  }
  0x19   :  { %102 = dma.hbm_to_vmem [thread:$0]  %s95_s1, 2048, %s97_s20, [#allocation9], %s3274_s23, %s3274_s23, %s3097_s30  }
  0x1a   :  { %s126_s25 = sshll.u32 %s3107_s24, 4  ;;  %s127_s25 = int_to_ptr.vmem [resolvable:$true] %s126_s25 }
  0x1b   :  { %132 = dma.hbm_to_vmem [thread:$0]  %s125_s5, 3072, %s127_s25, [#allocation12], %s3104_s21, %s3104_s21, %s3105_s22  }
  0x1c   :  { %3083 = dma.done.wait [#allocation3], 3072  }
  0x1d   :  { %3084 = vsyncadd [#allocation3], 4294964224 }
  0x1e   :  { %3085 = dma.done.wait [#allocation6], 8192  }
  0x1f   :  { %3086 = vsyncadd [#allocation6], 4294959104 }
  0x20   :  { %3087 = dma.done.wait [#allocation9], 4096  }
  0x21   :  { %3088 = vsyncadd [#allocation9], 4294963200 }
  0x22   :  { %3089 = dma.done.wait [#allocation12], 9216  }
  0x23   :  { %3090 = vsyncadd [#allocation12], 4294958080  ;;  %v1950_v0 = vld [vmem:[#allocation2 + $0xa8] sm:$0xf]  ;;  %v2654_v1 = vld [vmem:[#allocation2 + $0xb0] sm:$0xf0] }
  0x24   :  { %v2653_v2 = vld [vmem:[#allocation2 + $0xac] sm:$0xf]  ;;  %v1951_v3 = vor.u32 %v2654_v1, %v1950_v0  ;;  %v1952_v4 = vld [vmem:[#allocation2 + $0xb4] sm:$0xf0]  ;;  %v1938_v5 = vld [vmem:[#allocation2 + $0x90] sm:$0xf] }
  0x25   :  { %v2651_v6 = vld [vmem:[#allocation2 + $0x98] sm:$0xf0]  ;;  %v1955_v7 = vor.u32 %v2653_v2, %v1952_v4  ;;  %v2650_v8 = vld [vmem:[#allocation2 + $0x94] sm:$0xf]  ;;  %v1940_v9 = vld [vmem:[#allocation2 + $0x9c] sm:$0xf0] }
  0x26   :  { %v1958_v10 = vld [vmem:[#allocation2 + $0xb0] sm:$0xf]  ;;  %332 = vmatpush.bf16.msra.mxu0 %v1951_v3  ;;  %v1939_v11 = vor.u32 %v2651_v6, %v1938_v5  ;;  %v2655_v12 = vld [vmem:[#allocation2 + $0xb8] sm:$0xf0]  ;;  %v1943_v13 = vor.u32 %v2650_v8, %v1940_v9  ;;  %v1926_v15 = vld [vmem:[#allocation2 + $0x78] sm:$0xf] }
  0x27   :  { %345 = vmatpush.bf16.msra.mxu1 %v1955_v7  ;;  %v1959_v14 = vor.u32 %v2655_v12, %v1958_v10  ;;  %v2648_v16 = vld [vmem:[#allocation2 + $0x80] sm:$0xf0]  ;;  %v1946_v17 = vld [vmem:[#allocation2 + $0x98] sm:$0xf]  ;;  %v2647_v18 = vld [vmem:[#allocation2 + $0x7c] sm:$0xf] }
  0x28   :  { %v1928_v19 = vld [vmem:[#allocation2 + $0x84] sm:$0xf0]  ;;  %v2652_v20 = vld [vmem:[#allocation2 + $0xa0] sm:$0xf0]  ;;  %v1927_v22 = vor.u32 %v2648_v16, %v1926_v15  ;;  %v1934_v23 = vld [vmem:[#allocation2 + $0x80] sm:$0xf] }
  0x29   :  { %358 = vmatpush.bf16.msra.mxu2 %v1959_v14  ;;  %v1947_v21 = vor.u32 %v2652_v20, %v1946_v17  ;;  %v2649_v24 = vld [vmem:[#allocation2 + $0x88] sm:$0xf0]  ;;  %v1931_v25 = vor.u32 %v2647_v18, %v1928_v19  ;;  %v1914_v26 = vld [vmem:[#allocation2 + $0x60] sm:$0xf]  ;;  %v2644_v28 = vld [vmem:[#allocation2 + $0x64] sm:$0xf] }
  0x2a   :  { %333 = vmatpush.bf16.msra.mxu0 %v1939_v11  ;;  %v2645_v27 = vld [vmem:[#allocation2 + $0x68] sm:$0xf0]  ;;  %v1916_v29 = vld [vmem:[#allocation2 + $0x6c] sm:$0xf0]  ;;  %v1935_v30 = vor.u32 %v2649_v24, %v1934_v23  ;;  %v1922_v32 = vld [vmem:[#allocation2 + $0x68] sm:$0xf] }
  0x2b   :  { %346 = vmatpush.bf16.msra.mxu1 %v1943_v13  ;;  %v1915_v31 = vor.u32 %v2645_v27, %v1914_v26  ;;  %v2646_v33 = vld [vmem:[#allocation2 + $0x70] sm:$0xf0]  ;;  %v1919_v34 = vor.u32 %v2644_v28, %v1916_v29  ;;  %v1902_v35 = vld [vmem:[#allocation2 + $0x48] sm:$0xf]  ;;  %v2641_v37 = vld [vmem:[#allocation2 + $0x4c] sm:$0xf] }
  0x2c   :  { %v2642_v36 = vld [vmem:[#allocation2 + $0x50] sm:$0xf0]  ;;  %v1904_v38 = vld [vmem:[#allocation2 + $0x54] sm:$0xf0]  ;;  %v1923_v39 = vor.u32 %v2646_v33, %v1922_v32  ;;  %v1890_v41 = vld [vmem:[#allocation2 + $0x30] sm:$0xf] }
  0x2d   :  { %359 = vmatpush.bf16.msra.mxu2 %v1947_v21  ;;  %v1903_v40 = vor.u32 %v2642_v36, %v1902_v35  ;;  %v1910_v42 = vld [vmem:[#allocation2 + $0x50] sm:$0xf]  ;;  %v2643_v43 = vld [vmem:[#allocation2 + $0x58] sm:$0xf0]  ;;  %v1907_v44 = vor.u32 %v2641_v37, %v1904_v38  ;;  %v2671_v47 = vld [vmem:[#allocation5 + $0x74] sm:$0xf0] }
  0x2e   :  { %334 = vmatpush.bf16.msra.mxu0 %v1927_v22  ;;  %v2639_v45 = vld [vmem:[#allocation2 + $0x38] sm:$0xf0]  ;;  %v2018_v46 = vld [vmem:[#allocation5 + $0x70] sm:$0xf]  ;;  %v2638_v48 = vld [vmem:[#allocation2 + $0x34] sm:$0xf]  ;;  %v1911_v52 = vor.u32 %v2643_v43, %v1910_v42 }
  0x2f   :  { %347 = vmatpush.bf16.msra.mxu1 %v1931_v25  ;;  %v1892_v49 = vld [vmem:[#allocation2 + $0x3c] sm:$0xf0]  ;;  %v2019_v50 = vor.u32 %v2671_v47, %v2018_v46  ;;  %v2669_v53 = vld [vmem:[#allocation5 + $0x64] sm:$0xf0]  ;;  %v1891_v54 = vor.u32 %v2639_v45, %v1890_v41  ;;  %v1878_v55 = vld [vmem:[#allocation2 + $0x18] sm:$0xf] }
  0x30   :  { %v2010_v51 = vld [vmem:[#allocation5 + $0x60] sm:$0xf]  ;;  %v1898_v56 = vld [vmem:[#allocation2 + $0x38] sm:$0xf]  ;;  %v2640_v57 = vld [vmem:[#allocation2 + $0x40] sm:$0xf0]  ;;  %v1895_v59 = vor.u32 %v2638_v48, %v1892_v49 }
  0x31   :  { %360 = vmatpush.bf16.msra.mxu2 %v1935_v30  ;;  %671 = vmatpush.bf16.msra.mxu3 %v2019_v50  ;;  %v2011_v58 = vor.u32 %v2669_v53, %v2010_v51  ;;  %v2636_v60 = vld [vmem:[#allocation2 + $0x20] sm:$0xf0]  ;;  %v2002_v61 = vld [vmem:[#allocation5 + $0x50] sm:$0xf]  ;;  %v2667_v62 = vld [vmem:[#allocation5 + $0x54] sm:$0xf0]  ;;  %v1899_v1 = vor.u32 %v2640_v57, %v1898_v56 }
  0x32   :  { %335 = vmatpush.bf16.msra.mxu0 %v1915_v31  ;;  %v2635_v63 = vld [vmem:[#allocation2 + $0x1c] sm:$0xf]  ;;  %v1880_v0 = vld [vmem:[#allocation2 + $0x24] sm:$0xf0]  ;;  %v1866_v2 = vld [vmem:[#allocation2] sm:$0xf]  ;;  %v1879_v3 = vor.u32 %v2636_v60, %v1878_v55  ;;  %v2003_v7 = vor.u32 %v2667_v62, %v2002_v61 }
  0x33   :  { %348 = vmatpush.bf16.msra.mxu1 %v1919_v34  ;;  %v2633_v4 = vld [vmem:[#allocation2 + $0x8] sm:$0xf0]  ;;  %v1886_v5 = vld [vmem:[#allocation2 + $0x20] sm:$0xf]  ;;  %v1883_v8 = vor.u32 %v2635_v63, %v1880_v0  ;;  %v2632_v9 = vld [vmem:[#allocation2 + $0x4] sm:$0xf] }
  0x34   :  { %v2637_v6 = vld [vmem:[#allocation2 + $0x28] sm:$0xf0]  ;;  %v1994_v10 = vld [vmem:[#allocation5 + $0x40] sm:$0xf]  ;;  %v2665_v11 = vld [vmem:[#allocation5 + $0x44] sm:$0xf0]  ;;  %v1867_v18 = vor.u32 %v2633_v4, %v1866_v2 }
  0x35   :  { %361 = vmatpush.bf16.msra.mxu2 %v1923_v39  ;;  %672 = vmatpush.bf16.msra.mxu3 %v2011_v58  ;;  %v1868_v12 = vld [vmem:[#allocation2 + $0xc] sm:$0xf0]  ;;  %v2687_v14 = vld [vmem:[#allocation5 + $0xf4] sm:$0xf0]  ;;  %v1887_v15 = vor.u32 %v2637_v6, %v1886_v5  ;;  %v1874_v19 = vld [vmem:[#allocation2 + $0x8] sm:$0xf]  ;;  %v1995_v21 = vor.u32 %v2665_v11, %v1994_v10 }
  0x36   :  { %336 = vmatpush.bf16.msra.mxu0 %v1903_v40  ;;  %v2082_v13 = vld [vmem:[#allocation5 + $0xf0] sm:$0xf]  ;;  %v2703_v17 = vld [vmem:[#allocation5 + $0x174] sm:$0xf0]  ;;  %v2634_v20 = vld [vmem:[#allocation2 + $0x10] sm:$0xf0]  ;;  %v1871_v22 = vor.u32 %v2632_v9, %v1868_v12 }
  0x37   :  { %349 = vmatpush.bf16.msra.mxu1 %v1907_v44  ;;  %v2146_v16 = vld [vmem:[#allocation5 + $0x170] sm:$0xf]  ;;  %v2083_v23 = vor.u32 %v2687_v14, %v2082_v13  ;;  %v2074_v24 = vld [vmem:[#allocation5 + $0xe0] sm:$0xf]  ;;  %v2670_v25 = vld [vmem:[#allocation5 + $0x74] sm:$0xf]  ;;  %v1875_v31 = vor.u32 %v2634_v20, %v1874_v19 }
  0x38   :  { %v2020_v26 = vld [vmem:[#allocation5 + $0x78] sm:$0xf0]  ;;  %v2685_v27 = vld [vmem:[#allocation5 + $0xe4] sm:$0xf0]  ;;  %v1986_v28 = vld [vmem:[#allocation5 + $0x30] sm:$0xf]  ;;  %v2147_v30 = vor.u32 %v2703_v17, %v2146_v16 }
  0x39   :  { %362 = vmatpush.bf16.msra.mxu2 %v1911_v52  ;;  %673 = vmatpush.bf16.msra.mxu3 %v2003_v7  ;;  %v2663_v29 = vld [vmem:[#allocation5 + $0x34] sm:$0xf0]  ;;  %v2138_v32 = vld [vmem:[#allocation5 + $0x160] sm:$0xf]  ;;  %v2701_v33 = vld [vmem:[#allocation5 + $0x164] sm:$0xf0]  ;;  %v2023_v36 = vor.u32 %v2670_v25, %v2020_v26  ;;  %v2075_v37 = vor.u32 %v2685_v27, %v2074_v24 }
  0x3a   :  { %337 = vmatpush.bf16.msra.mxu0 %v1891_v54  ;;  %s3275_s29 = sld [smem:[#allocation23_spill]]  ;;  %v2066_v35 = vld [vmem:[#allocation5 + $0xd0] sm:$0xf]  ;;  %v2683_v38 = vld [vmem:[#allocation5 + $0xd4] sm:$0xf0]  ;;  %v1987_v39 = vor.u32 %v2663_v29, %v1986_v28  ;;  %v2139_v44 = vor.u32 %v2701_v33, %v2138_v32  ;;  %s1835_s21 = sshll.u32 %s3270_s15, 4  ;;  %s1836_s21 = int_to_ptr.hbm [resolvable:$true] %s1835_s21 }
  0x3b   :  { %350 = vmatpush.bf16.msra.mxu1 %v1895_v59  ;;  %v2668_v40 = vld [vmem:[#allocation5 + $0x64] sm:$0xf]  ;;  %v2012_v41 = vld [vmem:[#allocation5 + $0x68] sm:$0xf0]  ;;  %v1978_v42 = vld [vmem:[#allocation5 + $0x20] sm:$0xf]  ;;  %v2067_v48 = vor.u32 %v2683_v38, %v2066_v35 }
  0x3c   :  { %v2661_v43 = vld [vmem:[#allocation5 + $0x24] sm:$0xf0]  ;;  %v2130_v45 = vld [vmem:[#allocation5 + $0x150] sm:$0xf]  ;;  %v2699_v46 = vld [vmem:[#allocation5 + $0x154] sm:$0xf0]  ;;  %v2015_v47 = vor.u32 %v2668_v40, %v2012_v41 }
  0x3d   :  { %363 = vmatpush.bf16.msra.mxu2 %v1899_v1  ;;  %674 = vmatpush.bf16.msra.mxu3 %v1995_v21  ;;  %v2058_v49 = vld [vmem:[#allocation5 + $0xc0] sm:$0xf]  ;;  %v1979_v50 = vor.u32 %v2661_v43, %v1978_v42  ;;  %v2666_v51 = vld [vmem:[#allocation5 + $0x54] sm:$0xf]  ;;  %v2004_v52 = vld [vmem:[#allocation5 + $0x58] sm:$0xf0]  ;;  %v2131_v56 = vor.u32 %v2699_v46, %v2130_v45 }
  0x3e   :  { %338 = vmatpush.bf16.msra.mxu0 %v1879_v3  ;;  %v2681_v53 = vld [vmem:[#allocation5 + $0xc4] sm:$0xf0]  ;;  %v1970_v54 = vld [vmem:[#allocation5 + $0x10] sm:$0xf]  ;;  %v2659_v55 = vld [vmem:[#allocation5 + $0x14] sm:$0xf0]  ;;  %v2007_v57 = vor.u32 %v2666_v51, %v2004_v52 }
  0x3f   :  { %351 = vmatpush.bf16.msra.mxu1 %v1883_v8  ;;  %v2059_v58 = vor.u32 %v2681_v53, %v2058_v49  ;;  %v2050_v59 = vld [vmem:[#allocation5 + $0xb0] sm:$0xf]  ;;  %v1971_v60 = vor.u32 %v2659_v55, %v1970_v54  ;;  %v2664_v61 = vld [vmem:[#allocation5 + $0x44] sm:$0xf]  ;;  %v1996_v62 = vld [vmem:[#allocation5 + $0x48] sm:$0xf0] }
  0x40   :  { %v163_v34 = vld [vmem:[%s3275_s29] sm:$0xf]  ;;  %v2679_v63 = vld [vmem:[#allocation5 + $0xb4] sm:$0xf0]  ;;  %v2657_v1 = vld [vmem:[#allocation5 + $0x4] sm:$0xf0]  ;;  %v1999_v4 = vor.u32 %v2664_v61, %v1996_v62 }
  0x41   :  { %364 = vmatpush.bf16.msra.mxu2 %v1887_v15  ;;  %675 = vmatpush.bf16.msra.mxu3 %v1987_v39  ;;  %v1962_v0 = vld [vmem:[#allocation5] sm:$0xf]  ;;  %v2686_v2 = vld [vmem:[#allocation5 + $0xf4] sm:$0xf]  ;;  %v2084_v3 = vld [vmem:[#allocation5 + $0xf8] sm:$0xf0]  ;;  %v2051_v5 = vor.u32 %v2679_v63, %v2050_v59 }
  0x42   :  { %339 = vmatpush.bf16.msra.mxu0 %v1867_v18  ;;  %v1963_v6 = vor.u32 %v2657_v1, %v1962_v0  ;;  %v2662_v7 = vld [vmem:[#allocation5 + $0x34] sm:$0xf]  ;;  %v1988_v8 = vld [vmem:[#allocation5 + $0x38] sm:$0xf0]  ;;  %v2042_v9 = vld [vmem:[#allocation5 + $0xa0] sm:$0xf]  ;;  %v2087_v11 = vor.u32 %v2686_v2, %v2084_v3 }
  0x43   :  { %352 = vmatpush.bf16.msra.mxu1 %v1871_v22  ;;  %v2677_v10 = vld [vmem:[#allocation5 + $0xa4] sm:$0xf0]  ;;  %v1991_v12 = vor.u32 %v2662_v7, %v1988_v8  ;;  %v2034_v14 = vld [vmem:[#allocation5 + $0x90] sm:$0xf]  ;;  %v2675_v15 = vld [vmem:[#allocation5 + $0x94] sm:$0xf0] }
  0x44   :  { %v2043_v13 = vor.u32 %v2677_v10, %v2042_v9  ;;  %v2035_v16 = vor.u32 %v2675_v15, %v2034_v14  ;;  %v2026_v17 = vld [vmem:[#allocation5 + $0x80] sm:$0xf]  ;;  %v2673_v18 = vld [vmem:[#allocation5 + $0x84] sm:$0xf0]  ;;  %v2702_v19 = vld [vmem:[#allocation5 + $0x174] sm:$0xf] }
  0x45   :  { %340 = vmatmul.bf16.vlgmr.msra.gmra.mxu0 %v163_v34  ;;  %365 = vmatpush.bf16.msra.mxu2 %v1875_v31  ;;  %v2148_v20 = vld [vmem:[#allocation5 + $0x178] sm:$0xf0]  ;;  %v2027_v21 = vor.u32 %v2673_v18, %v2026_v17  ;;  %v1980_v24 = vld [vmem:[#allocation5 + $0x28] sm:$0xf0]  ;;  %v2684_v25 = vld [vmem:[#allocation5 + $0xe4] sm:$0xf] }
  0x46   :  { %684 = vmatpush.bf16.msrb.mxu0 %v2083_v23  ;;  %353 = vmatmul.bf16.vlgmr.msra.gmra.mxu1 %v163_v34  ;;  %v2151_v22 = vor.u32 %v2702_v19, %v2148_v20  ;;  %v2660_v23 = vld [vmem:[#allocation5 + $0x24] sm:$0xf]  ;;  %v2076_v27 = vld [vmem:[#allocation5 + $0xe8] sm:$0xf0]  ;;  %v2122_v31 = vld [vmem:[#allocation5 + $0x140] sm:$0xf] }
  0x47   :  { %697 = vmatpush.bf16.msrb.mxu1 %v2147_v30  ;;  %676 = vmatpush.bf16.msra.mxu3 %v1979_v50  ;;  %v1983_v26 = vor.u32 %v2660_v23, %v1980_v24  ;;  %v2700_v28 = vld [vmem:[#allocation5 + $0x164] sm:$0xf]  ;;  %v2079_v29 = vor.u32 %v2684_v25, %v2076_v27  ;;  %v2140_v30 = vld [vmem:[#allocation5 + $0x168] sm:$0xf0]  ;;  %v2697_v32 = vld [vmem:[#allocation5 + $0x144] sm:$0xf0] }
  0x48   :  { %366 = vmatmul.bf16.vlgmr.msra.gmra.mxu2 %v163_v34  ;;  %v2143_v33 = vor.u32 %v2700_v28, %v2140_v30  ;;  %v2123_v34 = vor.u32 %v2697_v32, %v2122_v31  ;;  %v2658_v35 = vld [vmem:[#allocation5 + $0x14] sm:$0xf]  ;;  %v2068_v39 = vld [vmem:[#allocation5 + $0xd8] sm:$0xf0]  ;;  %v2695_v45 = vld [vmem:[#allocation5 + $0x134] sm:$0xf0] }
  0x49   :  { %710 = vmatpush.bf16.msrb.mxu2 %v2023_v36  ;;  %v1972_v36 = vld [vmem:[#allocation5 + $0x18] sm:$0xf0]  ;;  %v2698_v40 = vld [vmem:[#allocation5 + $0x154] sm:$0xf]  ;;  %v2680_v49 = vld [vmem:[#allocation5 + $0xc4] sm:$0xf] }
  0x4a   :  { %685 = vmatpush.bf16.msrb.mxu0 %v2075_v37  ;;  %v2682_v37 = vld [vmem:[#allocation5 + $0xd4] sm:$0xf]  ;;  %v1975_v38 = vor.u32 %v2658_v35, %v1972_v36  ;;  %v2132_v41 = vld [vmem:[#allocation5 + $0x158] sm:$0xf0]  ;;  %v2060_v51 = vld [vmem:[#allocation5 + $0xc8] sm:$0xf0] }
  0x4b   :  { %698 = vmatpush.bf16.msrb.mxu1 %v2139_v44  ;;  %677 = vmatpush.bf16.msra.mxu3 %v1971_v60  ;;  %v2071_v42 = vor.u32 %v2682_v37, %v2068_v39  ;;  %v2135_v43 = vor.u32 %v2698_v40, %v2132_v41  ;;  %v2114_v44 = vld [vmem:[#allocation5 + $0x130] sm:$0xf]  ;;  %v2696_v52 = vld [vmem:[#allocation5 + $0x144] sm:$0xf]  ;;  %v2124_v53 = vld [vmem:[#allocation5 + $0x148] sm:$0xf0]  ;;  %v2063_v54 = vor.u32 %v2680_v49, %v2060_v51 }
  0x4c   :  { %v2115_v46 = vor.u32 %v2695_v45, %v2114_v44  ;;  %v2127_v55 = vor.u32 %v2696_v52, %v2124_v53  ;;  %v2678_v59 = vld [vmem:[#allocation5 + $0xb4] sm:$0xf]  ;;  %v2052_v60 = vld [vmem:[#allocation5 + $0xb8] sm:$0xf0]  ;;  %v2098_v1 = vld [vmem:[#allocation5 + $0x110] sm:$0xf] }
  0x4d   :  { %711 = vmatpush.bf16.msrb.mxu2 %v2015_v47  ;;  %v2656_v47 = vld [vmem:[#allocation5 + $0x4] sm:$0xf]  ;;  %v2694_v61 = vld [vmem:[#allocation5 + $0x134] sm:$0xf]  ;;  %v2055_v62 = vor.u32 %v2678_v59, %v2052_v60  ;;  %v2116_v63 = vld [vmem:[#allocation5 + $0x138] sm:$0xf0] }
  0x4e   :  { %686 = vmatpush.bf16.msrb.mxu0 %v2067_v48  ;;  %v1964_v48 = vld [vmem:[#allocation5 + $0x8] sm:$0xf0]  ;;  %v2119_v0 = vor.u32 %v2694_v61, %v2116_v63  ;;  %v2691_v2 = vld [vmem:[#allocation5 + $0x114] sm:$0xf0]  ;;  %v2090_v10 = vld [vmem:[#allocation5 + $0x100] sm:$0xf] }
  0x4f   :  { %699 = vmatpush.bf16.msrb.mxu1 %v2131_v56  ;;  %678 = vmatpush.bf16.msra.mxu3 %v1963_v6  ;;  %v1967_v50 = vor.u32 %v2656_v47, %v1964_v48  ;;  %v2106_v56 = vld [vmem:[#allocation5 + $0x120] sm:$0xf]  ;;  %v2099_v3 = vor.u32 %v2691_v2, %v2098_v1  ;;  %v2692_v6 = vld [vmem:[#allocation5 + $0x124] sm:$0xf]  ;;  %v2108_v8 = vld [vmem:[#allocation5 + $0x128] sm:$0xf0] }
  0x50   :  { %v2111_v9 = vor.u32 %v2692_v6, %v2108_v8  ;;  %v2036_v14 = vld [vmem:[#allocation5 + $0x98] sm:$0xf0]  ;;  %v2690_v15 = vld [vmem:[#allocation5 + $0x114] sm:$0xf]  ;;  %v2672_v19 = vld [vmem:[#allocation5 + $0x84] sm:$0xf] }
  0x51   :  { %712 = vmatpush.bf16.msrb.mxu2 %v2007_v57  ;;  %v2693_v57 = vld [vmem:[#allocation5 + $0x124] sm:$0xf0]  ;;  %v2100_v17 = vld [vmem:[#allocation5 + $0x118] sm:$0xf0]  ;;  %v2028_v20 = vld [vmem:[#allocation5 + $0x88] sm:$0xf0] }
  0x52   :  { %687 = vmatpush.bf16.msrb.mxu0 %v2059_v58  ;;  %v2107_v58 = vor.u32 %v2693_v57, %v2106_v56  ;;  %v2103_v18 = vor.u32 %v2690_v15, %v2100_v17  ;;  %v2031_v23 = vor.u32 %v2672_v19, %v2028_v20  ;;  %v196_v25 = vld [vmem:[%s3257_s2] sm:$0x7]  ;;  %v2711_v27 = vld [vmem:[#allocation7 + $0x38] sm:$0xff]  ;;  %v2706_v51 = vld [vmem:[#allocation7 + $0x10] sm:$0xff]  ;;  %s3109_s15 = smov [#allocation15]   ;;  %s1846_s23 = sshll.u32 %s3271_s16, 4  ;;  %s1847_s23 = int_to_ptr.hbm [resolvable:$true] %s1846_s23 }
  0x53   :  { %723 = vmatpush.bf16.msrb.mxu3 %v2087_v11  ;;  %700 = vmatpush.bf16.msrb.mxu1 %v2123_v34  ;;  %v2689_v11 = vld [vmem:[#allocation5 + $0x104] sm:$0xf0]  ;;  %v199_v28 = vperm.slane %v196_v25, 1  ;;  %v200_v35 = vperm.slane %v196_v25, 2  ;;  %v2708_v47 = vld [vmem:[#allocation7 + $0x20] sm:$0xff]  ;;  %v2719_v48 = vld [vmem:[#allocation7 + $0x78] sm:$0xff] }
  0x54   :  { %v2709_v34 = vld [vmem:[#allocation7 + $0x28] sm:$0xff]  ;;  %v2707_v49 = vld [vmem:[#allocation7 + $0x18] sm:$0xff]  ;;  %v2714_v57 = vld [vmem:[#allocation7 + $0x50] sm:$0xff]  ;;  %s1844_s20 = sshll.u32 %s3109_s15, 4  ;;  %s1845_s20 = int_to_ptr.vmem [resolvable:$true] %s1844_s20 }
  0x55   :  { %713 = vmatpush.bf16.msrb.mxu2 %v1999_v4  ;;  %v2676_v4 = vld [vmem:[#allocation5 + $0xa4] sm:$0xf]  ;;  %v2717_v52 = vld [vmem:[#allocation7 + $0x68] sm:$0xff]  ;;  %v2715_v56 = vld [vmem:[#allocation7 + $0x58] sm:$0xff] }
  0x56   :  { %688 = vmatpush.bf16.msrb.mxu0 %v2051_v5  ;;  %v2044_v5 = vld [vmem:[#allocation5 + $0xa8] sm:$0xf0]  ;;  %v425_v59 = vld [vmem:[%s3259_s4] sm:$0x3] }
  0x57   :  { %724 = vmatpush.bf16.msrb.mxu3 %v2079_v29  ;;  %701 = vmatpush.bf16.msrb.mxu1 %v2115_v46  ;;  %v2047_v7 = vor.u32 %v2676_v4, %v2044_v5  ;;  %v2710_v29 = vld [vmem:[#allocation7 + $0x30] sm:$0xff]  ;;  %v2705_v53 = vld [vmem:[#allocation7 + $0x8] sm:$0xff]  ;;  %v2712_v60 = vld [vmem:[#allocation7 + $0x40] sm:$0xff]  ;;  %v428_v8 = vperm.slane %v425_v59, 1 }
  0x59   :  { %714 = vmatpush.bf16.msrb.mxu2 %v1991_v12  ;;  %v2091_v12 = vor.u32 %v2689_v11, %v2090_v10 }
  0x5a   :  { %689 = vmatpush.bf16.msrb.mxu0 %v2043_v13  ;;  %v2674_v13 = vld [vmem:[#allocation5 + $0x94] sm:$0xf] }
  0x5b   :  { %725 = vmatpush.bf16.msrb.mxu3 %v2071_v42  ;;  %702 = vmatpush.bf16.msrb.mxu1 %v2107_v58  ;;  %v2713_v58 = vld [vmem:[#allocation7 + $0x48] sm:$0xff] }
  0x5d   :  { %715 = vmatpush.bf16.msrb.mxu2 %v1983_v26  ;;  %v198_v26 = vperm.slane %v196_v25, 0  ;;  %v2276_v25 = vld [vmem:[#allocation8 + $0x78] sm:$0xf0] }
  0x5e   :  { %690 = vmatpush.bf16.msrb.mxu0 %v2035_v16  ;;  %v2039_v16 = vor.u32 %v2674_v13, %v2036_v14 }
  0x5f   :  { %726 = vmatpush.bf16.msrb.mxu3 %v2063_v54  ;;  %703 = vmatpush.bf16.msrb.mxu1 %v2099_v3  ;;  %v2716_v54 = vld [vmem:[#allocation7 + $0x60] sm:$0xff] }
  0x61   :  { %716 = vmatpush.bf16.msrb.mxu2 %v1975_v38 }
  0x62   :  { %691 = vmatpush.bf16.msrb.mxu0 %v2027_v21  ;;  %v2688_v21 = vld [vmem:[#allocation5 + $0x104] sm:$0xf] }
  0x63   :  { %727 = vmatpush.bf16.msrb.mxu3 %v2055_v62  ;;  %704 = vmatpush.bf16.msrb.mxu1 %v2091_v12  ;;  %v427_v62 = vperm.slane %v425_v59, 0  ;;  %v2722_v59 = vld [vmem:[#allocation8 + $0x14] sm:$0xf] }
  0x65   :  { %717 = vmatpush.bf16.msrb.mxu2 %v1967_v50  ;;  %v2718_v50 = vld [vmem:[#allocation7 + $0x70] sm:$0xff] }
  0x66   :  { %736 = vmatpush.bf16.msra.mxu0 %v2151_v22  ;;  %v2092_v22 = vld [vmem:[#allocation5 + $0x108] sm:$0xf0] }
  0x67   :  { %728 = vmatpush.bf16.msrb.mxu3 %v2047_v7  ;;  %v2095_v24 = vor.u32 %v2688_v21, %v2092_v22  ;;  %885 = vmatpush.bf16.msra.mxu1 %v2711_v27  ;;  %v2274_v21 = vld [vmem:[#allocation8 + $0x70] sm:$0xf]  ;;  %v2735_v22 = vld [vmem:[#allocation8 + $0x74] sm:$0xf0]  ;;  %v2266_v27 = vld [vmem:[#allocation8 + $0x60] sm:$0xf] }
  0x69   :  { %898 = vmatpush.bf16.msra.mxu2 %v2719_v48  ;;  %v2244_v48 = vld [vmem:[#allocation8 + $0x38] sm:$0xf0] }
  0x6a   :  { %737 = vmatpush.bf16.msra.mxu0 %v2143_v33 }
  0x6b   :  { %729 = vmatpush.bf16.msrb.mxu3 %v2039_v16  ;;  %886 = vmatpush.bf16.msra.mxu1 %v2710_v29  ;;  %v2732_v29 = vld [vmem:[#allocation8 + $0x64] sm:$0xf] }
  0x6d   :  { %899 = vmatpush.bf16.msra.mxu2 %v2718_v50 }
  0x6e   :  { %738 = vmatpush.bf16.msra.mxu0 %v2135_v43 }
  0x6f   :  { %730 = vmatpush.bf16.msrb.mxu3 %v2031_v23  ;;  %887 = vmatpush.bf16.msra.mxu1 %v2709_v34  ;;  %v2734_v23 = vld [vmem:[#allocation8 + $0x74] sm:$0xf]  ;;  %v2731_v34 = vld [vmem:[#allocation8 + $0x54] sm:$0xf0] }
  0x71   :  { %900 = vmatpush.bf16.msra.mxu2 %v2717_v52  ;;  %v2725_v52 = vld [vmem:[#allocation8 + $0x24] sm:$0xf0] }
  0x72   :  { %739 = vmatpush.bf16.msra.mxu0 %v2127_v55  ;;  %v2704_v55 = vld [vmem:[#allocation7] sm:$0xff] }
  0x73   :  { %888 = vmatpush.bf16.msra.mxu1 %v2708_v47  ;;  %v2726_v47 = vld [vmem:[#allocation8 + $0x34] sm:$0xf] }
  0x74   :  { %v2247_v50 = vor.u32 %v2726_v47, %v2244_v48  ;;  %v2300_v48 = vld [vmem:[#allocation10 + $0x28] sm:$0xf0] }
  0x75   :  { %901 = vmatpush.bf16.msra.mxu2 %v2716_v54 }
  0x76   :  { %740 = vmatpush.bf16.msra.mxu0 %v2119_v0 }
  0x77   :  { %889 = vmatpush.bf16.msra.mxu1 %v2707_v49 }
  0x79   :  { %902 = vmatpush.bf16.msra.mxu2 %v2715_v56 }
  0x7a   :  { %741 = vmatpush.bf16.msra.mxu0 %v2111_v9 }
  0x7b   :  { %890 = vmatpush.bf16.msra.mxu1 %v2706_v51  ;;  %v2234_v51 = vld [vmem:[#allocation8 + $0x20] sm:$0xf] }
  0x7c   :  { %v2235_v54 = vor.u32 %v2725_v52, %v2234_v51  ;;  %v2739_v51 = vld [vmem:[#allocation10 + $0x14] sm:$0xf0]  ;;  %v2738_v52 = vld [vmem:[#allocation10 + $0x14] sm:$0xf] }
  0x7d   :  { %903 = vmatpush.bf16.msra.mxu2 %v2714_v57  ;;  %v2226_v57 = vld [vmem:[#allocation8 + $0x10] sm:$0xf] }
  0x7e   :  { %742 = vmatpush.bf16.msra.mxu0 %v2103_v18 }
  0x7f   :  { %891 = vmatpush.bf16.msra.mxu1 %v2705_v53  ;;  %v2724_v53 = vld [vmem:[#allocation8 + $0x24] sm:$0xf] }
  0x81   :  { %904 = vmatpush.bf16.msra.mxu2 %v2713_v58  ;;  %v2723_v58 = vld [vmem:[#allocation8 + $0x14] sm:$0xf0] }
  0x82   :  { %743 = vmatpush.bf16.msra.mxu0 %v2095_v24  ;;  %v2275_v24 = vor.u32 %v2735_v22, %v2274_v21  ;;  %v2324_v21 = vld [vmem:[#allocation10 + $0x58] sm:$0xf0] }
  0x83   :  { %892 = vmatpush.bf16.msra.mxu1 %v2704_v55  ;;  %v2236_v55 = vld [vmem:[#allocation8 + $0x28] sm:$0xf0] }
  0x84   :  { %v2239_v56 = vor.u32 %v2724_v53, %v2236_v55 }
  0x85   :  { %905 = vmatpush.bf16.msra.mxu2 %v2712_v60  ;;  %v2227_v60 = vor.u32 %v2723_v58, %v2226_v57  ;;  %v2737_v57 = vld [vmem:[#allocation10 + $0x4] sm:$0xf0]  ;;  %v2736_v58 = vld [vmem:[#allocation10 + $0x4] sm:$0xf] }
  0xc2   :  { %v341_v30 = vpop.f32.mrf.mxu0 }
  0xc3   :  { %v342_v31 = vadd.f32 %v341_v30, %v198_v26  ;;  %v354_v32 = vpop.f32.mrf.mxu1  ;;  %v2279_v26 = vor.u32 %v2734_v23, %v2276_v25  ;;  %v2314_v25 = vld [vmem:[#allocation10 + $0x40] sm:$0xf] }
  0xc4   :  { %v355_v33 = vadd.f32 %v354_v32, %v199_v28  ;;  %v2733_v28 = vld [vmem:[#allocation8 + $0x64] sm:$0xf0] }
  0xc5   :  { %2841 = vtanh.f32 %v342_v31  ;;  %v2267_v30 = vor.u32 %v2733_v28, %v2266_v27  ;;  %v2268_v31 = vld [vmem:[#allocation8 + $0x68] sm:$0xf0]  ;;  %v2744_v27 = vld [vmem:[#allocation10 + $0x44] sm:$0xf] }
  0xc6   :  { %2843 = vtanh.f32 %v355_v33  ;;  %v2271_v32 = vor.u32 %v2732_v29, %v2268_v31  ;;  %v2258_v33 = vld [vmem:[#allocation8 + $0x50] sm:$0xf]  ;;  %v2316_v28 = vld [vmem:[#allocation10 + $0x48] sm:$0xf0] }
  0xc7   :  { %v2306_v31 = vld [vmem:[#allocation10 + $0x30] sm:$0xf] }
  0xca   :  { %v343_v36 = vpop.f32.mrf.mxu0 }
  0xcb   :  { %v2842_v37 = vpop.eup %2841  ;;  %v356_v38 = vpop.f32.mrf.mxu1  ;;  %v2259_v36 = vor.u32 %v2731_v34, %v2258_v33  ;;  %v2742_v33 = vld [vmem:[#allocation10 + $0x34] sm:$0xf]  ;;  %v2308_v34 = vld [vmem:[#allocation10 + $0x38] sm:$0xf0] }
  0xcc   :  { %v367_v39 = vpop.f32.mrf.mxu2  ;;  %v2844_v40 = vpop.eup %2843  ;;  %v374_v42 = vpack.c.bf16 %v2842_v37, %v2842_v37  ;;  %v2260_v37 = vld [vmem:[#allocation8 + $0x58] sm:$0xf0]  ;;  %v2250_v38 = vld [vmem:[#allocation8 + $0x40] sm:$0xf] }
  0xcd   :  { %v368_v41 = vadd.f32 %v367_v39, %v200_v35  ;;  %v375_v43 = vpack.c.bf16 %v2844_v40, %v2844_v40  ;;  %v2730_v35 = vld [vmem:[#allocation8 + $0x54] sm:$0xf]  ;;  %v2729_v39 = vld [vmem:[#allocation8 + $0x44] sm:$0xf0] }
  0xce   :  { %679 = vmatmul.bf16.vlgmr.msra.gmra.mxu3 %v374_v42  ;;  %718 = vmatmul.bf16.vlgmr.msrb.gmra.mxu2 %v374_v42  ;;  %v2263_v40 = vor.u32 %v2730_v35, %v2260_v37  ;;  %v2252_v42 = vld [vmem:[#allocation8 + $0x48] sm:$0xf0]  ;;  %v2839_v35 = vld [vmem:[%s3261_s6] ss:$0 sm:$0xff]  ;;  %v2311_v37 = vor.u32 %v2742_v33, %v2308_v34 }
  0xcf   :  { %2845 = vtanh.f32 %v368_v41  ;;  %692 = vmatmul.bf16.vlgmr.msrb.gmra.mxu0 %v375_v43  ;;  %1015 = vmatpush.bf16.msra.mxu3 %v2275_v24  ;;  %v2728_v41 = vld [vmem:[#allocation8 + $0x44] sm:$0xf]  ;;  %v929_v33 = vld [vmem:[%s3263_s8] sm:$0x3] }
  0xd0   :  { %1028 = vmatpush.bf16.msrb.mxu0 %v2279_v26  ;;  %v2745_v26 = vld [vmem:[#allocation10 + $0x44] sm:$0xf0] }
  0xd1   :  { %v2315_v29 = vor.u32 %v2745_v26, %v2314_v25 }
  0xd3   :  { %1016 = vmatpush.bf16.msra.mxu3 %v2267_v30  ;;  %v2319_v30 = vor.u32 %v2744_v27, %v2316_v28  ;;  %v2767_v27 = vld [vmem:[#allocation11 + $0x7c] sm:$0xf]  ;;  %v2490_v28 = vld [vmem:[#allocation11 + $0x120] sm:$0xf] }
  0xd4   :  { %v369_v44 = vpop.f32.mrf.mxu2  ;;  %1029 = vmatpush.bf16.msrb.mxu0 %v2271_v32  ;;  %v2743_v32 = vld [vmem:[#allocation10 + $0x34] sm:$0xf0] }
  0xd5   :  { %v2846_v45 = vpop.eup %2845  ;;  %v2255_v44 = vor.u32 %v2728_v41, %v2252_v42 }
  0xd6   :  { %v376_v46 = vpack.c.bf16 %v2846_v45, %v2846_v45  ;;  %v2242_v45 = vld [vmem:[#allocation8 + $0x30] sm:$0xf] }
  0xd7   :  { %1017 = vmatpush.bf16.msra.mxu3 %v2259_v36  ;;  %v2307_v36 = vor.u32 %v2743_v32, %v2306_v31  ;;  %v2794_v31 = vld [vmem:[#allocation11 + $0x154] sm:$0xf]  ;;  %v2516_v32 = vld [vmem:[#allocation11 + $0x15c] sm:$0xf0] }
  0xd8   :  { %705 = vmatmul.bf16.vlgmr.msrb.gmra.mxu1 %v376_v46  ;;  %1030 = vmatpush.bf16.msrb.mxu0 %v2263_v40 }
  0xdc   :  { %1031 = vmatpush.bf16.msrb.mxu0 %v2255_v44  ;;  %v2298_v44 = vld [vmem:[#allocation10 + $0x20] sm:$0xf] }
  0xde   :  { %731 = vmatmul.bf16.vlgmr.msrb.gmra.mxu3 %v375_v43  ;;  %v2251_v43 = vor.u32 %v2729_v39, %v2250_v38 }
  0xdf   :  { %744 = vmatmul.bf16.vlgmr.msra.gmra.mxu0 %v376_v46  ;;  %v2727_v46 = vld [vmem:[#allocation8 + $0x34] sm:$0xf0] }
  0xe0   :  { %1018 = vmatpush.bf16.msra.mxu3 %v2251_v43  ;;  %v2243_v49 = vor.u32 %v2727_v46, %v2242_v45  ;;  %1032 = vmatpush.bf16.msrb.mxu0 %v2247_v50  ;;  %v2741_v45 = vld [vmem:[#allocation10 + $0x24] sm:$0xf0]  ;;  %v2740_v46 = vld [vmem:[#allocation10 + $0x24] sm:$0xf]  ;;  %v2290_v50 = vld [vmem:[#allocation10 + $0x10] sm:$0xf] }
  0xe1   :  { %v2299_v47 = vor.u32 %v2741_v45, %v2298_v44  ;;  %v2291_v53 = vor.u32 %v2739_v51, %v2290_v50  ;;  %v2786_v44 = vld [vmem:[#allocation11 + $0x110] sm:$0xf0]  ;;  %v2504_v45 = vld [vmem:[#allocation11 + $0x144] sm:$0xf0]  ;;  %v2759_v50 = vld [vmem:[#allocation11 + $0x38] sm:$0xf0] }
  0xe4   :  { %1019 = vmatpush.bf16.msra.mxu3 %v2243_v49  ;;  %1033 = vmatpush.bf16.msrb.mxu0 %v2239_v56  ;;  %v2303_v49 = vor.u32 %v2740_v46, %v2300_v48  ;;  %v2282_v56 = vld [vmem:[#allocation10] sm:$0xf]  ;;  %v932_v46 = vperm.slane %v929_v33, 1 }
  0xe8   :  { %1020 = vmatpush.bf16.msra.mxu3 %v2235_v54  ;;  %v2292_v54 = vld [vmem:[#allocation10 + $0x18] sm:$0xf0] }
  0xe9   :  { %v2295_v55 = vor.u32 %v2738_v52, %v2292_v54  ;;  %v2761_v52 = vld [vmem:[#allocation11 + $0x4c] sm:$0xf]  ;;  %v2384_v54 = vld [vmem:[#allocation11 + $0x54] sm:$0xf0] }
  0xec   :  { %1021 = vmatpush.bf16.msra.mxu3 %v2227_v60  ;;  %v2284_v60 = vld [vmem:[#allocation10 + $0x8] sm:$0xf0] }
 0x14c   :  { %v693_v61 = vpop.f32.mrf.mxu0 }
 0x151   :  { %v680_v63 = vpop.f32.mrf.mxu3  ;;  %v719_v0 = vpop.f32.mrf.mxu2 }
 0x152   :  { %v681_v1 = vadd.f32 %v680_v63, %v427_v62  ;;  %v720_v13 = vadd.f32 %v719_v0, %v428_v8  ;;  %v2218_v63 = vld [vmem:[#allocation8] sm:$0xf]  ;;  %v2721_v0 = vld [vmem:[#allocation8 + $0x4] sm:$0xf0]  ;;  %v2750_v8 = vld [vmem:[#allocation10 + $0x74] sm:$0xf] }
 0x154   :  { %v695_v2 = vpop.f32.mrf.mxu0  ;;  %v694_v3 = vadd.f32 %v693_v61, %v681_v1  ;;  %v2228_v61 = vld [vmem:[#allocation8 + $0x18] sm:$0xf0]  ;;  %v2720_v1 = vld [vmem:[#allocation8 + $0x4] sm:$0xf] }
 0x155   :  { %v706_v4 = vpop.f32.mrf.mxu1  ;;  %v2231_v62 = vor.u32 %v2722_v59, %v2228_v61  ;;  %v2219_v2 = vor.u32 %v2721_v0, %v2218_v63  ;;  %v2283_v59 = vor.u32 %v2737_v57, %v2282_v56  ;;  %v2287_v61 = vor.u32 %v2736_v58, %v2284_v60  ;;  %v2774_v63 = vld [vmem:[#allocation11 + $0xb0] sm:$0xf0]  ;;  %v2418_v0 = vld [vmem:[#allocation11 + $0x90] sm:$0xf]  ;;  %v2783_v58 = vld [vmem:[#allocation11 + $0xf8] sm:$0xf0] }
 0x156   :  { %v707_v5 = vadd.f32 %v706_v4, %v694_v3  ;;  %v2220_v3 = vld [vmem:[#allocation8 + $0x8] sm:$0xf0]  ;;  %v2492_v56 = vld [vmem:[#allocation11 + $0x12c] sm:$0xf0] }
 0x157   :  { %1034 = vmatpush.bf16.msrb.mxu0 %v2231_v62  ;;  %v2223_v4 = vor.u32 %v2720_v1, %v2220_v3  ;;  %1022 = vmatpush.bf16.msra.mxu3 %v2219_v2  ;;  %v2430_v62 = vld [vmem:[#allocation11 + $0xa8] sm:$0xf]  ;;  %v2771_v2 = vld [vmem:[#allocation11 + $0x98] sm:$0xf0]  ;;  %v2466_v57 = vld [vmem:[#allocation11 + $0xf0] sm:$0xf] }
 0x158   :  { %2847 = vtanh.f32 %v707_v5  ;;  %v2431_v1 = vor.u32 %v2774_v63, %v2430_v62  ;;  %v2526_v3 = vld [vmem:[#allocation11 + $0x168] sm:$0xf]  ;;  %v2387_v63 = vor.u32 %v2761_v52, %v2384_v54 }
 0x159   :  { %v682_v6 = vpop.f32.mrf.mxu3  ;;  %v721_v7 = vpop.f32.mrf.mxu2  ;;  %v2456_v54 = vld [vmem:[#allocation11 + $0xe4] sm:$0xf0] }
 0x15a   :  { %v2338_v6 = vld [vmem:[#allocation10 + $0x70] sm:$0xf]  ;;  %v2751_v7 = vld [vmem:[#allocation10 + $0x74] sm:$0xf0] }
 0x15b   :  { %1035 = vmatpush.bf16.msrb.mxu0 %v2223_v4  ;;  %v2798_v4 = vld [vmem:[#allocation11 + $0x170] sm:$0xf0]  ;;  %1504 = vmatpush.bf16.msrb.mxu3 %v2431_v1  ;;  %v2756_v1 = vld [vmem:[#allocation11 + $0x20] sm:$0xf0] }
 0x15c   :  { %v745_v9 = vpop.f32.mrf.mxu0 }
 0x15d   :  { %v708_v10 = vpop.f32.mrf.mxu1 }
 0x15e   :  { %v2848_v11 = vpop.eup %2847  ;;  %v2340_v10 = vld [vmem:[#allocation10 + $0x78] sm:$0xf0] }
 0x15f   :  { %v751_v12 = vpack.c.bf16 %v2848_v11, %v2848_v11  ;;  %v2330_v11 = vld [vmem:[#allocation10 + $0x60] sm:$0xf] }
 0x161   :  { %v732_v14 = vpop.f32.mrf.mxu3  ;;  %893 = vmatmul.bf16.vlgmr.msra.gmra.mxu1 %v751_v12  ;;  %v2749_v12 = vld [vmem:[#allocation10 + $0x64] sm:$0xf0] }
 0x162   :  { %v733_v15 = vadd.f32 %v732_v14, %v720_v13  ;;  %v2343_v13 = vor.u32 %v2750_v8, %v2340_v10  ;;  %v2748_v14 = vld [vmem:[#allocation10 + $0x64] sm:$0xf]  ;;  %v2406_v8 = vld [vmem:[#allocation11 + $0x78] sm:$0xf] }
 0x163   :  { %v2768_v10 = vld [vmem:[#allocation11 + $0x80] sm:$0xf0] }
 0x164   :  { %v746_v16 = vadd.f32 %v745_v9, %v733_v15  ;;  %v747_v17 = vpop.f32.mrf.mxu0  ;;  %v2339_v9 = vor.u32 %v2751_v7, %v2338_v6  ;;  %v2332_v15 = vld [vmem:[#allocation10 + $0x68] sm:$0xf0]  ;;  %1159 = vmatpush.bf16.msrb.mxu2 %v2343_v13  ;;  %v2514_v6 = vld [vmem:[#allocation11 + $0x150] sm:$0xf]  ;;  %v2419_v7 = vor.u32 %v2771_v2, %v2418_v0  ;;  %v2432_v13 = vld [vmem:[#allocation11 + $0xb4] sm:$0xf0]  ;;  %v2467_v2 = vor.u32 %v2783_v58, %v2466_v57 }
 0x165   :  { %v2335_v17 = vor.u32 %v2748_v14, %v2332_v15  ;;  %v2502_v15 = vld [vmem:[#allocation11 + $0x138] sm:$0xf]  ;;  %v2793_v57 = vld [vmem:[#allocation11 + $0x148] sm:$0xf0] }
 0x166   :  { %2849 = vtanh.f32 %v746_v16  ;;  %1146 = vmatpush.bf16.msrb.mxu1 %v2339_v9  ;;  %v2331_v16 = vor.u32 %v2749_v12, %v2330_v11  ;;  %v2795_v9 = vld [vmem:[#allocation11 + $0x158] sm:$0xf0]  ;;  %v2773_v12 = vld [vmem:[#allocation11 + $0xac] sm:$0xf]  ;;  %1505 = vmatpush.bf16.msrb.mxu3 %v2419_v7  ;;  %v2358_v0 = vld [vmem:[#allocation11 + $0x18] sm:$0xf] }
 0x167   :  { %v2515_v11 = vor.u32 %v2795_v9, %v2514_v6  ;;  %v2435_v14 = vor.u32 %v2773_v12, %v2432_v13  ;;  %v2359_v6 = vor.u32 %v2756_v1, %v2358_v0  ;;  %v2753_v9 = vld [vmem:[#allocation11 + $0x8] sm:$0xf0]  ;;  %v2438_v12 = vld [vmem:[#allocation11 + $0xb0] sm:$0xf]  ;;  %v2775_v13 = vld [vmem:[#allocation11 + $0xb8] sm:$0xf0] }
 0x168   :  { %1160 = vmatpush.bf16.msrb.mxu2 %v2335_v17  ;;  %v2770_v17 = vld [vmem:[#allocation11 + $0x94] sm:$0xf]  ;;  %v2498_v0 = vld [vmem:[#allocation11 + $0x128] sm:$0xf] }
 0x169   :  { %v734_v18 = vpop.f32.mrf.mxu3 }
 0x16a   :  { %v2322_v18 = vld [vmem:[#allocation10 + $0x50] sm:$0xf]  ;;  %1147 = vmatpush.bf16.msrb.mxu1 %v2331_v16  ;;  %v2792_v16 = vld [vmem:[#allocation11 + $0x140] sm:$0xf0] }
 0x16b   :  { %v2503_v25 = vor.u32 %v2792_v16, %v2502_v15 }
 0x16c   :  { %v2850_v19 = vpop.eup %2849 }
 0x16d   :  { %v752_v20 = vpack.c.bf16 %v2850_v19, %v2850_v19  ;;  %v2747_v19 = vld [vmem:[#allocation10 + $0x54] sm:$0xf0] }
 0x16e   :  { %v2323_v22 = vor.u32 %v2747_v19, %v2322_v18  ;;  %v2420_v18 = vld [vmem:[#allocation11 + $0x9c] sm:$0xf0]  ;;  %v2407_v19 = vor.u32 %v2768_v10, %v2406_v8 }
 0x16f   :  { %906 = vmatmul.bf16.vlgmr.msra.gmra.mxu2 %v752_v20  ;;  %v2746_v20 = vld [vmem:[#allocation10 + $0x54] sm:$0xf]  ;;  %v2346_v8 = vld [vmem:[#allocation11] sm:$0xf] }
 0x170   :  { %v2327_v24 = vor.u32 %v2746_v20, %v2324_v21  ;;  %1148 = vmatpush.bf16.msrb.mxu1 %v2323_v22  ;;  %v2423_v20 = vor.u32 %v2770_v17, %v2420_v18  ;;  %v2797_v21 = vld [vmem:[#allocation11 + $0x16c] sm:$0xf]  ;;  %v2528_v22 = vld [vmem:[#allocation11 + $0x174] sm:$0xf0]  ;;  %1506 = vmatpush.bf16.msrb.mxu3 %v2407_v19  ;;  %v2347_v16 = vor.u32 %v2753_v9, %v2346_v8  ;;  %v2787_v8 = vld [vmem:[#allocation11 + $0x118] sm:$0xf0] }
 0x171   :  { %v2531_v26 = vor.u32 %v2797_v21, %v2528_v22  ;;  %v2439_v18 = vor.u32 %v2775_v13, %v2438_v12  ;;  %v2372_v21 = vld [vmem:[#allocation11 + $0x3c] sm:$0xf0]  ;;  %v2426_v22 = vld [vmem:[#allocation11 + $0x98] sm:$0xf] }
 0x172   :  { %1161 = vmatpush.bf16.msrb.mxu2 %v2327_v24  ;;  %v2765_v24 = vld [vmem:[#allocation11 + $0x68] sm:$0xf0]  ;;  %v2474_v12 = vld [vmem:[#allocation11 + $0xf8] sm:$0xf] }
 0x174   :  { %1149 = vmatpush.bf16.msrb.mxu1 %v2315_v29  ;;  %v2789_v29 = vld [vmem:[#allocation11 + $0x128] sm:$0xf0] }
 0x176   :  { %1162 = vmatpush.bf16.msrb.mxu2 %v2319_v30  ;;  %v2408_v30 = vld [vmem:[#allocation11 + $0x84] sm:$0xf0] }
 0x178   :  { %1150 = vmatpush.bf16.msrb.mxu1 %v2307_v36  ;;  %v2762_v36 = vld [vmem:[#allocation11 + $0x50] sm:$0xf0] }
 0x17a   :  { %1163 = vmatpush.bf16.msrb.mxu2 %v2311_v37  ;;  %v2411_v37 = vor.u32 %v2767_v27, %v2408_v30  ;;  %v2480_v30 = vld [vmem:[#allocation11 + $0x114] sm:$0xf0] }
 0x17c   :  { %1151 = vmatpush.bf16.msrb.mxu1 %v2299_v47 }
 0x17e   :  { %1164 = vmatpush.bf16.msrb.mxu2 %v2303_v49  ;;  %v2370_v49 = vld [vmem:[#allocation11 + $0x30] sm:$0xf] }
 0x17f   :  { %v2371_v62 = vor.u32 %v2759_v50, %v2370_v49  ;;  %v2402_v49 = vld [vmem:[#allocation11 + $0x68] sm:$0xf] }
 0x180   :  { %1152 = vmatpush.bf16.msrb.mxu1 %v2291_v53 }
 0x182   :  { %1165 = vmatpush.bf16.msrb.mxu2 %v2295_v55  ;;  %v2788_v55 = vld [vmem:[#allocation11 + $0x124] sm:$0xf] }
 0x183   :  { %v2495_v60 = vor.u32 %v2788_v55, %v2492_v56  ;;  %v2510_v55 = vld [vmem:[#allocation11 + $0x140] sm:$0xf] }
 0x184   :  { %1153 = vmatpush.bf16.msrb.mxu1 %v2283_v59  ;;  %v2511_v58 = vor.u32 %v2793_v57, %v2510_v55  ;;  %v2809_v55 = vld [vmem:[#allocation13 + $0x48] sm:$0xff]  ;;  %v2808_v57 = vld [vmem:[#allocation13 + $0x40] sm:$0xff] }
 0x186   :  { %1166 = vmatpush.bf16.msrb.mxu2 %v2287_v61 }
 0x188   :  { %1530 = vmatpush.bf16.msra.mxu1 %v2435_v14 }
 0x18a   :  { %1543 = vmatpush.bf16.msra.mxu2 %v2531_v26  ;;  %v2777_v26 = vld [vmem:[#allocation11 + $0xc8] sm:$0xf0] }
 0x18c   :  { %1531 = vmatpush.bf16.msra.mxu1 %v2423_v20  ;;  %v2758_v20 = vld [vmem:[#allocation11 + $0x34] sm:$0xf] }
 0x190   :  { %1532 = vmatpush.bf16.msra.mxu1 %v2411_v37  ;;  %v2414_v37 = vld [vmem:[#allocation11 + $0x80] sm:$0xf] }
 0x1de   :  { %v894_v5 = vpop.f32.mrf.mxu1 }
 0x1df   :  { %v895_v38 = vadd.f32 %v2839_v35, %v894_v5  ;;  %v2527_v5 = vor.u32 %v2798_v4, %v2526_v3  ;;  %v2382_v35 = vld [vmem:[#allocation11 + $0x48] sm:$0xf]  ;;  %v931_v3 = vperm.slane %v929_v33, 0  ;;  %v2454_v4 = vld [vmem:[#allocation11 + $0xd8] sm:$0xf] }
 0x1e0   :  { %v2383_v48 = vor.u32 %v2762_v36, %v2382_v35  ;;  %v2799_v33 = vld [vmem:[#allocation11 + $0x178] sm:$0xf0]  ;;  %v2360_v36 = vld [vmem:[#allocation11 + $0x24] sm:$0xf0] }
 0x1e1   :  { %1517 = vmatpush.bf16.msra.mxu0 %v2527_v5  ;;  %v2780_v5 = vld [vmem:[#allocation11 + $0xe0] sm:$0xf0]  ;;  %v2755_v35 = vld [vmem:[#allocation11 + $0x1c] sm:$0xf] }
 0x1e2   :  { %v2455_v10 = vor.u32 %v2780_v5, %v2454_v4  ;;  %v2378_v4 = vld [vmem:[#allocation11 + $0x38] sm:$0xf]  ;;  %v2760_v5 = vld [vmem:[#allocation11 + $0x40] sm:$0xf0] }
 0x1e5   :  { %1518 = vmatpush.bf16.msra.mxu0 %v2515_v11 }
 0x1e6   :  { %v896_v23 = vpop.f32.mrf.mxu1 }
 0x1e7   :  { %v2394_v23 = vld [vmem:[#allocation11 + $0x60] sm:$0xf] }
 0x1e8   :  { %v2395_v34 = vor.u32 %v2765_v24, %v2394_v23  ;;  %v2375_v23 = vor.u32 %v2758_v20, %v2372_v21  ;;  %v2772_v24 = vld [vmem:[#allocation11 + $0xa0] sm:$0xf0] }
 0x1e9   :  { %1519 = vmatpush.bf16.msra.mxu0 %v2503_v25  ;;  %v2442_v25 = vld [vmem:[#allocation11 + $0xc0] sm:$0xf]  ;;  %v2427_v27 = vor.u32 %v2772_v24, %v2426_v22  ;;  %v2778_v24 = vld [vmem:[#allocation11 + $0xd0] sm:$0xf0] }
 0x1ea   :  { %1507 = vmatpush.bf16.msrb.mxu3 %v2395_v34  ;;  %v1060_v22 = vld [vmem:[%s3265_s10] sm:$0x3] }
 0x1ee   :  { %1508 = vmatpush.bf16.msrb.mxu3 %v2383_v48  ;;  %v2348_v48 = vld [vmem:[#allocation11 + $0xc] sm:$0xf0] }
 0x1f2   :  { %v907_v39 = vpop.f32.mrf.mxu2  ;;  %1509 = vmatpush.bf16.msrb.mxu3 %v2371_v62  ;;  %v2776_v62 = vld [vmem:[#allocation11 + $0xc4] sm:$0xf] }
 0x1f3   :  { %v908_v40 = vadd.f32 %v907_v39, %v895_v38  ;;  %v2519_v38 = vor.u32 %v2794_v31, %v2516_v32  ;;  %v2491_v39 = vor.u32 %v2789_v29, %v2490_v28  ;;  %v2443_v28 = vor.u32 %v2777_v26, %v2442_v25  ;;  %v2785_v29 = vld [vmem:[#allocation11 + $0x10c] sm:$0xf]  ;;  %v2534_v31 = vld [vmem:[#allocation11 + $0x170] sm:$0xf] }
 0x1f4   :  { %v2483_v32 = vor.u32 %v2785_v29, %v2480_v30  ;;  %v2535_v34 = vor.u32 %v2799_v33, %v2534_v31  ;;  %v1062_v25 = vperm.slane %v1060_v22, 0  ;;  %v2807_v29 = vld [vmem:[#allocation13 + $0x38] sm:$0xff]  ;;  %v1063_v31 = vperm.slane %v1060_v22, 1  ;;  %v2814_v33 = vld [vmem:[#allocation13 + $0x70] sm:$0xff] }
 0x1f5   :  { %2851 = vtanh.f32 %v908_v40  ;;  %v2764_v40 = vld [vmem:[#allocation11 + $0x64] sm:$0xf]  ;;  %1544 = vmatpush.bf16.msra.mxu2 %v2519_v38  ;;  %1520 = vmatpush.bf16.msra.mxu0 %v2491_v39  ;;  %v2363_v38 = vor.u32 %v2755_v35, %v2360_v36  ;;  %v2769_v39 = vld [vmem:[#allocation11 + $0x88] sm:$0xf0]  ;;  %v2815_v30 = vld [vmem:[#allocation13 + $0x78] sm:$0xff] }
 0x1f6   :  { %1510 = vmatpush.bf16.msrb.mxu3 %v2359_v6  ;;  %v2379_v6 = vor.u32 %v2760_v5, %v2378_v4 }
 0x1fa   :  { %v909_v41 = vpop.f32.mrf.mxu2  ;;  %1511 = vmatpush.bf16.msrb.mxu3 %v2347_v16  ;;  %v2754_v16 = vld [vmem:[#allocation11 + $0x10] sm:$0xf0] }
 0x1fb   :  { %v2852_v42 = vpop.eup %2851  ;;  %v2396_v41 = vld [vmem:[#allocation11 + $0x6c] sm:$0xf0] }
 0x1fc   :  { %v912_v43 = vpack.c.bf16 %v2852_v42, %v2852_v42  ;;  %v2791_v42 = vld [vmem:[#allocation11 + $0x13c] sm:$0xf]  ;;  %v2399_v51 = vor.u32 %v2764_v40, %v2396_v41  ;;  %v2415_v40 = vor.u32 %v2769_v39, %v2414_v37  ;;  %v2782_v41 = vld [vmem:[#allocation11 + $0xf4] sm:$0xf] }
 0x1fd   :  { %v2507_v47 = vor.u32 %v2791_v42, %v2504_v45  ;;  %v2468_v42 = vld [vmem:[#allocation11 + $0xfc] sm:$0xf0]  ;;  %v2796_v45 = vld [vmem:[#allocation11 + $0x160] sm:$0xf0] }
 0x1fe   :  { %1023 = vmatmul.bf16.vlgmr.msra.gmra.mxu3 %v912_v43  ;;  %1036 = vmatmul.bf16.vlgmr.msrb.gmra.mxu0 %v912_v43  ;;  %v2478_v43 = vld [vmem:[#allocation11 + $0x108] sm:$0xf] }
 0x1ff   :  { %v2479_v53 = vor.u32 %v2786_v44, %v2478_v43  ;;  %1545 = vmatpush.bf16.msra.mxu2 %v2507_v47  ;;  %1533 = vmatpush.bf16.msra.mxu1 %v2399_v51  ;;  %v2522_v43 = vld [vmem:[#allocation11 + $0x158] sm:$0xf]  ;;  %v2471_v44 = vor.u32 %v2782_v41, %v2468_v42  ;;  %v2752_v47 = vld [vmem:[#allocation11 + $0x4] sm:$0xf]  ;;  %v2766_v51 = vld [vmem:[#allocation11 + $0x70] sm:$0xf0] }
 0x200   :  { %1556 = vmatpush.bf16.msra.mxu3 %v2439_v18  ;;  %v2351_v50 = vor.u32 %v2752_v47, %v2348_v48  ;;  %v2403_v52 = vor.u32 %v2766_v51, %v2402_v49  ;;  %v2462_v18 = vld [vmem:[#allocation11 + $0xe0] sm:$0xf]  ;;  %v2802_v48 = vld [vmem:[#allocation13 + $0x10] sm:$0xff]  ;;  %v2811_v49 = vld [vmem:[#allocation13 + $0x58] sm:$0xff] }
 0x201   :  { %1521 = vmatpush.bf16.msra.mxu0 %v2479_v53  ;;  %v2779_v53 = vld [vmem:[#allocation11 + $0xdc] sm:$0xf]  ;;  %v2812_v47 = vld [vmem:[#allocation13 + $0x60] sm:$0xff]  ;;  %v2801_v51 = vld [vmem:[#allocation13 + $0x8] sm:$0xff] }
 0x202   :  { %v2459_v56 = vor.u32 %v2779_v53, %v2456_v54  ;;  %v2821_v53 = vld [vmem:[#allocation13 + $0xa8] sm:$0xff]  ;;  %v2800_v54 = vld [vmem:[#allocation13] sm:$0xff] }
 0x203   :  { %1546 = vmatpush.bf16.msra.mxu2 %v2495_v60  ;;  %1534 = vmatpush.bf16.msra.mxu1 %v2387_v63  ;;  %v2763_v60 = vld [vmem:[#allocation11 + $0x58] sm:$0xf0]  ;;  %v2444_v63 = vld [vmem:[#allocation11 + $0xcc] sm:$0xf0] }
 0x204   :  { %1557 = vmatpush.bf16.msra.mxu3 %v2427_v27  ;;  %v2447_v1 = vor.u32 %v2776_v62, %v2444_v63  ;;  %v2816_v62 = vld [vmem:[#allocation13 + $0x80] sm:$0xff] }
 0x205   :  { %1522 = vmatpush.bf16.msra.mxu0 %v2467_v2  ;;  %v2790_v2 = vld [vmem:[#allocation11 + $0x130] sm:$0xf0]  ;;  %v1240_v63 = vld [vmem:[%s3267_s12] sm:$0x7]  ;;  %s3108_s12 = smov [#allocation14]  }
 0x206   :  { %s1833_s18 = sshll.u32 %s3108_s12, 4  ;;  %s1834_s18 = int_to_ptr.vmem [resolvable:$true] %s1833_s18 }
 0x207   :  { %1535 = vmatpush.bf16.msra.mxu1 %v2375_v23  ;;  %1547 = vmatpush.bf16.msra.mxu2 %v2483_v32  ;;  %v2450_v23 = vld [vmem:[#allocation11 + $0xc8] sm:$0xf]  ;;  %v2806_v32 = vld [vmem:[#allocation13 + $0x30] sm:$0xff] }
 0x208   :  { %1558 = vmatpush.bf16.msra.mxu3 %v2415_v40  ;;  %v2451_v26 = vor.u32 %v2778_v24, %v2450_v23 }
 0x209   :  { %1523 = vmatpush.bf16.msra.mxu0 %v2455_v10  ;;  %v2366_v10 = vld [vmem:[#allocation11 + $0x20] sm:$0xf] }
 0x20b   :  { %1536 = vmatpush.bf16.msra.mxu1 %v2363_v38  ;;  %1548 = vmatpush.bf16.msra.mxu2 %v2471_v44  ;;  %v2805_v38 = vld [vmem:[#allocation13 + $0x28] sm:$0xff] }
 0x20c   :  { %1559 = vmatpush.bf16.msra.mxu3 %v2403_v52  ;;  %v2813_v44 = vld [vmem:[#allocation13 + $0x68] sm:$0xff]  ;;  %v2810_v52 = vld [vmem:[#allocation13 + $0x50] sm:$0xff] }
 0x20d   :  { %1524 = vmatpush.bf16.msra.mxu0 %v2443_v28 }
 0x20f   :  { %1537 = vmatpush.bf16.msra.mxu1 %v2351_v50  ;;  %1549 = vmatpush.bf16.msra.mxu2 %v2459_v56  ;;  %v2822_v50 = vld [vmem:[#allocation13 + $0xb0] sm:$0xff]  ;;  %v2820_v56 = vld [vmem:[#allocation13 + $0xa0] sm:$0xff] }
 0x211   :  { %1569 = vmatpush.bf16.msrb.mxu0 %v2535_v34 }
 0x213   :  { %1550 = vmatpush.bf16.msra.mxu2 %v2447_v1 }
 0x27b   :  { %v1037_v59 = vpop.f32.mrf.mxu0 }
 0x27c   :  { %v1038_v61 = vadd.f32 %v1037_v59, %v932_v46  ;;  %v2523_v46 = vor.u32 %v2796_v45, %v2522_v43  ;;  %v2390_v59 = vld [vmem:[#allocation11 + $0x50] sm:$0xf]  ;;  %v2804_v43 = vld [vmem:[#allocation13 + $0x20] sm:$0xff]  ;;  %v2823_v45 = vld [vmem:[#allocation13 + $0xb8] sm:$0xff] }
 0x27e   :  { %2853 = vtanh.f32 %v1038_v61  ;;  %1570 = vmatpush.bf16.msrb.mxu0 %v2523_v46  ;;  %v2391_v61 = vor.u32 %v2763_v60, %v2390_v59  ;;  %v2803_v46 = vld [vmem:[#allocation13 + $0x18] sm:$0xff]  ;;  %v2818_v59 = vld [vmem:[#allocation13 + $0x90] sm:$0xff]  ;;  %v2817_v60 = vld [vmem:[#allocation13 + $0x88] sm:$0xff] }
 0x280   :  { %1560 = vmatpush.bf16.msra.mxu3 %v2391_v61 }
 0x281   :  { %v1024_v7 = vpop.f32.mrf.mxu3 }
 0x282   :  { %v1025_v11 = vadd.f32 %v1024_v7, %v931_v3  ;;  %1571 = vmatpush.bf16.msrb.mxu0 %v2511_v58  ;;  %v2499_v3 = vor.u32 %v2790_v2, %v2498_v0  ;;  %v2486_v7 = vld [vmem:[#allocation11 + $0x110] sm:$0xf]  ;;  %v2819_v58 = vld [vmem:[#allocation13 + $0x98] sm:$0xff]  ;;  %v1242_v0 = vperm.slane %v1240_v63, 0 }
 0x283   :  { %v1039_v14 = vpop.f32.mrf.mxu0  ;;  %v2487_v9 = vor.u32 %v2787_v8, %v2486_v7 }
 0x284   :  { %v2854_v15 = vpop.eup %2853  ;;  %1041 = vst [vmem:[#allocation14] sm:$0xff] %v1025_v11  ;;  %v2757_v11 = vld [vmem:[#allocation11 + $0x28] sm:$0xf0]  ;;  %1561 = vmatpush.bf16.msra.mxu3 %v2379_v6  ;;  %v2784_v14 = vld [vmem:[#allocation11 + $0x100] sm:$0xf0] }
 0x285   :  { %v1043_v17 = vpack.c.bf16 %v2854_v15, %v2854_v15  ;;  %v2367_v13 = vor.u32 %v2757_v11, %v2366_v10  ;;  %v2354_v15 = vld [vmem:[#allocation11 + $0x8] sm:$0xf]  ;;  %1838 = dma.vmem_to_hbm [thread:$0]  %s1834_s18, 128, %s1836_s21, [#allocation4]  }
 0x286   :  { %1572 = vmatpush.bf16.msrb.mxu0 %v2499_v3  ;;  %v2355_v20 = vor.u32 %v2754_v16, %v2354_v15  ;;  %v1243_v3 = vperm.slane %v1240_v63, 1 }
 0x287   :  { %1154 = vmatmul.bf16.vlgmr.msrb.gmra.mxu1 %v1043_v17  ;;  %1167 = vmatmul.bf16.vlgmr.msrb.gmra.mxu2 %v1043_v17  ;;  %v2475_v17 = vor.u32 %v2784_v14, %v2474_v12  ;;  %v1244_v14 = vperm.slane %v1240_v63, 2 }
 0x288   :  { %1562 = vmatpush.bf16.msra.mxu3 %v2367_v13  ;;  %1784 = vmatpush.bf16.msrb.mxu1 %v2807_v29  ;;  %v2840_v29 = vld [vmem:[%s3269_s14] ss:$0 sm:$0xff] }
 0x289   :  { %v1026_v19 = vpop.f32.mrf.mxu3  ;;  %1797 = vmatpush.bf16.msrb.mxu2 %v2815_v30 }
 0x28a   :  { %1573 = vmatpush.bf16.msrb.mxu0 %v2487_v9  ;;  %v2781_v19 = vld [vmem:[#allocation11 + $0xe8] sm:$0xf0] }
 0x28b   :  { %v2463_v21 = vor.u32 %v2781_v19, %v2462_v18 }
 0x28c   :  { %1563 = vmatpush.bf16.msra.mxu3 %v2355_v20  ;;  %1785 = vmatpush.bf16.msrb.mxu1 %v2806_v32 }
 0x28d   :  { %1798 = vmatpush.bf16.msrb.mxu2 %v2814_v33 }
 0x28e   :  { %1574 = vmatpush.bf16.msrb.mxu0 %v2475_v17 }
 0x290   :  { %1786 = vmatpush.bf16.msrb.mxu1 %v2805_v38 }
 0x291   :  { %1799 = vmatpush.bf16.msrb.mxu2 %v2813_v44 }
 0x292   :  { %1575 = vmatpush.bf16.msrb.mxu0 %v2463_v21 }
 0x294   :  { %1787 = vmatpush.bf16.msrb.mxu1 %v2804_v43 }
 0x295   :  { %1800 = vmatpush.bf16.msrb.mxu2 %v2812_v47 }
 0x296   :  { %1576 = vmatpush.bf16.msrb.mxu0 %v2451_v26 }
 0x298   :  { %1788 = vmatpush.bf16.msrb.mxu1 %v2803_v46 }
 0x299   :  { %1801 = vmatpush.bf16.msrb.mxu2 %v2811_v49 }
 0x29c   :  { %1789 = vmatpush.bf16.msrb.mxu1 %v2802_v48 }
 0x29d   :  { %1802 = vmatpush.bf16.msrb.mxu2 %v2810_v52 }
 0x2a0   :  { %1790 = vmatpush.bf16.msrb.mxu1 %v2801_v51 }
 0x2a1   :  { %1803 = vmatpush.bf16.msrb.mxu2 %v2809_v55 }
 0x2a4   :  { %1791 = vmatpush.bf16.msrb.mxu1 %v2800_v54 }
 0x2a5   :  { %1804 = vmatpush.bf16.msrb.mxu2 %v2808_v57 }
 0x304   :  { %v1155_v27 = vpop.f32.mrf.mxu1 }
 0x305   :  { %v1156_v28 = vadd.f32 %v1155_v27, %v1062_v25 }
 0x307   :  { %2855 = vtanh.f32 %v1156_v28 }
 0x30a   :  { %v1168_v34 = vpop.f32.mrf.mxu2 }
 0x30b   :  { %v1169_v35 = vadd.f32 %v1168_v34, %v1063_v31 }
 0x30c   :  { %v1157_v36 = vpop.f32.mrf.mxu1 }
 0x30d   :  { %v2856_v37 = vpop.eup %2855  ;;  %2857 = vtanh.f32 %v1169_v35 }
 0x30e   :  { %v1174_v39 = vpack.c.bf16 %v2856_v37, %v2856_v37 }
 0x310   :  { %1512 = vmatmul.bf16.vlgmr.msrb.gmra.mxu3 %v1174_v39  ;;  %1538 = vmatmul.bf16.vlgmr.msra.gmra.mxu1 %v1174_v39 }
 0x311   :  { %1810 = vmatpush.bf16.msrb.mxu3 %v2823_v45 }
 0x312   :  { %v1170_v40 = vpop.f32.mrf.mxu2 }
 0x313   :  { %v2858_v41 = vpop.eup %2857 }
 0x314   :  { %v1175_v42 = vpack.c.bf16 %v2858_v41, %v2858_v41 }
 0x315   :  { %1811 = vmatpush.bf16.msrb.mxu3 %v2822_v50 }
 0x316   :  { %1525 = vmatmul.bf16.vlgmr.msra.gmra.mxu0 %v1175_v42  ;;  %1551 = vmatmul.bf16.vlgmr.msra.gmra.mxu2 %v1175_v42 }
 0x319   :  { %1812 = vmatpush.bf16.msrb.mxu3 %v2821_v53 }
 0x31d   :  { %1813 = vmatpush.bf16.msrb.mxu3 %v2820_v56 }
 0x320   :  { %1564 = vmatmul.bf16.vlgmr.msra.gmra.mxu3 %v1174_v39 }
 0x321   :  { %1814 = vmatpush.bf16.msrb.mxu3 %v2819_v58 }
 0x325   :  { %1815 = vmatpush.bf16.msrb.mxu3 %v2818_v59 }
 0x326   :  { %1577 = vmatmul.bf16.vlgmr.msrb.gmra.mxu0 %v1175_v42 }
 0x329   :  { %1816 = vmatpush.bf16.msrb.mxu3 %v2817_v60 }
 0x32d   :  { %1817 = vmatpush.bf16.msrb.mxu3 %v2816_v62 }
 0x38d   :  { %v1539_v61 = vpop.f32.mrf.mxu1 }
 0x38e   :  { %v1540_v7 = vadd.f32 %v1539_v61, %v1243_v3 }
 0x393   :  { %v1513_v1 = vpop.f32.mrf.mxu3  ;;  %v1526_v2 = vpop.f32.mrf.mxu0 }
 0x394   :  { %v1514_v4 = vadd.f32 %v1513_v1, %v1242_v0 }
 0x395   :  { %v1541_v5 = vpop.f32.mrf.mxu1 }
 0x396   :  { %v1527_v6 = vadd.f32 %v1526_v2, %v1514_v4 }
 0x398   :  { %2859 = vtanh.f32 %v1527_v6 }
 0x399   :  { %v1552_v8 = vpop.f32.mrf.mxu2 }
 0x39a   :  { %v1553_v9 = vadd.f32 %v1552_v8, %v1540_v7 }
 0x39b   :  { %v1515_v10 = vpop.f32.mrf.mxu3  ;;  %v1528_v11 = vpop.f32.mrf.mxu0 }
 0x39c   :  { %2861 = vtanh.f32 %v1553_v9 }
 0x39e   :  { %v2860_v12 = vpop.eup %2859 }
 0x39f   :  { %v1585_v13 = vpack.c.bf16 %v2860_v12, %v2860_v12 }
 0x3a1   :  { %v1554_v15 = vpop.f32.mrf.mxu2  ;;  %1792 = vmatmul.bf16.vlgmr.msrb.gmra.mxu1 %v1585_v13 }
 0x3a2   :  { %v2862_v16 = vpop.eup %2861 }
 0x3a3   :  { %v1586_v17 = vpack.c.bf16 %v2862_v16, %v2862_v16  ;;  %v1565_v18 = vpop.f32.mrf.mxu3  ;;  %v1578_v19 = vpop.f32.mrf.mxu0 }
 0x3a4   :  { %v1566_v20 = vadd.f32 %v1565_v18, %v1244_v14 }
 0x3a5   :  { %1805 = vmatmul.bf16.vlgmr.msrb.gmra.mxu2 %v1586_v17 }
 0x3a6   :  { %v1579_v21 = vadd.f32 %v1578_v19, %v1566_v20 }
 0x3a8   :  { %2863 = vtanh.f32 %v1579_v21 }
 0x3ab   :  { %v1567_v22 = vpop.f32.mrf.mxu3  ;;  %v1580_v23 = vpop.f32.mrf.mxu0 }
 0x3ae   :  { %v2864_v24 = vpop.eup %2863 }
 0x3af   :  { %v1587_v25 = vpack.c.bf16 %v2864_v24, %v2864_v24 }
 0x3b1   :  { %1818 = vmatmul.bf16.vlgmr.msrb.gmra.mxu3 %v1587_v25 }
 0x41e   :  { %v1793_v26 = vpop.f32.mrf.mxu1 }
 0x41f   :  { %v1794_v31 = vadd.f32 %v2840_v29, %v1793_v26 }
 0x426   :  { %v1795_v27 = vpop.f32.mrf.mxu1 }
 0x428   :  { %v1806_v28 = vpop.f32.mrf.mxu2 }
 0x429   :  { %v1807_v32 = vadd.f32 %v1806_v28, %v1794_v31 }
 0x430   :  { %v1808_v30 = vpop.f32.mrf.mxu2 }
 0x434   :  { %v1819_v33 = vpop.f32.mrf.mxu3 }
 0x435   :  { %v1820_v34 = vadd.f32 %v1819_v33, %v1807_v32 }
 0x437   :  { %v1823_v35 = vmul.f32 0.5, %v1820_v34 }
 0x439   :  { %2865 = vtanh.f32 %v1823_v35 }
 0x43c   :  { %v1821_v36 = vpop.f32.mrf.mxu3 }
 0x43f   :  { %v2866_v37 = vpop.eup %2865 }
 0x440   :  { %v1825_v38 = vmul.f32 0.5, %v2866_v37 }
 0x442   :  { %v1826_v39 = vadd.f32 0.5, %v1825_v38 }
 0x444   :  { %1827 = vst [vmem:[#allocation15] sm:$0xff] %v1826_v39 }
 0x445   :  { %1849 = dma.vmem_to_hbm [thread:$0]  %s1845_s20, 128, %s1847_s23, [#allocation16]  }
 0x446   :  { %3091 = dma.done.wait [#allocation4], 128  }
 0x447   :  { %3092 = vsyncadd [#allocation4], 4294967168 }
 0x448   :  { %3093 = dma.done.wait [#allocation16], 128  }
 0x449   :  { %3094 = vsyncadd [#allocation16], 4294967168 }
 0x44a   :  { %1858 = vsyncpa [#allocation3], 1 }
 0x44b   :  { %1859 = vsyncpa [#allocation6], 1 }
 0x44c   :  { %1860 = vsyncpa [#allocation9], 1 }
 0x44d   :  { %1861 = vsyncpa [#allocation12], 1 }
 0x44e   :  { %1862 = vsyncpa [#allocation4], 1 }
 0x44f   :  { %1863 = vsyncpa [#allocation16], 1 }

</bundles_post_ra>
